<compile_context>
chip_gen: v7x
topology: tpu7x:2x2x1
jax: 0.10.0
libtpu: 0.0.40
codegen_flags: <defaults>
</compile_context>

<pallas_src>
import math
import jax
import jax.numpy as jnp
from jax.experimental import pallas as pl
from jax.experimental.pallas import tpu as pltpu  # noqa: F401  (TPU backend)

# ----------------------------- config (small) ---------------------------------
B, T = 2, 8              # batch, sequence length
D = 32                   # d_model
H = 4                    # attention heads
HD = D // H              # head dim
DFF = 64                 # feed-forward dim
TEXT_VOCAB = 50
VOCAB_PAD = 128          # lane-dense padded text vocab (one-hot embedding matmul)
PHON_VOCAB = 60
V_PAD = 128              # lane-dense padded logits width (multiple of 128)
QKV_STRIDE = 128         # Q/K/V column stride in the fused qkv weight (lane aligned)
N_LAYERS = 2
LN_EPS = 1e-5
NEG_INF = -1e9
PAD_ID = 0

MATMUL_DTYPE = jnp.bfloat16   # weight storage / MXU input dtype; accumulation stays f32


# ------------------------------ Pallas kernel ----------------------------------
def _layer_norm(x, g, b):
    mu = jnp.mean(x, axis=-1, keepdims=True)
    var = jnp.mean((x - mu) ** 2, axis=-1, keepdims=True)
    return (x - mu) * jax.lax.rsqrt(var + LN_EPS) * g + b


def fused_forward_kernel(text_ref, textcol_ref, emb_ref, pe_ref,
                         wqkv_ref, bqkv_ref, wo_ref, bo_ref,
                         ln1g_ref, ln1b_ref,
                         w1_ref, b1_ref, w2_ref, b2_ref,
                         ln2g_ref, ln2b_ref,
                         fcw_ref, fcb_ref,
                         o_ref):
    # Whole problem is VMEM-resident (~100 KB): no grid, no pipelining.

    # --- embedding lookup as a one-hot MXU matmul (replaces the XLA gather) ----
    iota_v = jax.lax.broadcasted_iota(jnp.int32, (B * T, VOCAB_PAD), 1)
    onehot = jnp.where(iota_v == textcol_ref[...], 1.0, 0.0)           # (B*T, 128) f32
    x2 = jnp.dot(onehot, emb_ref[...], preferred_element_type=jnp.float32)  # (B*T, D)
    x2 = x2 + pe_ref[...]       # positional encoding (pe_scale folded in at init)

    # --- key-padding mask derived in-kernel from the token ids -----------------
    # (B, 1, T): 0 = valid key, NEG_INF = pad key. Hoisted out of all loops.
    addmask = jnp.where(text_ref[...] == PAD_ID, NEG_INF, 0.0).astype(jnp.float32)
    addmask = addmask.reshape(B, 1, T)

    for li in range(N_LAYERS):   # static unroll (use fori_loop(unroll=True) if it grows)
        # --- fused QKV projection: Q/K/V blocks start at 128-lane boundaries ---
        xb = x2.astype(MATMUL_DTYPE)
        qkv = (jnp.dot(xb, wqkv_ref[li], preferred_element_type=jnp.float32)
               + bqkv_ref[li])                                        # (B*T, 3*128)
        q3 = qkv[:, 0 * QKV_STRIDE:0 * QKV_STRIDE + D].reshape(B, T, D)
        k3 = qkv[:, 1 * QKV_STRIDE:1 * QKV_STRIDE + D].reshape(B, T, D)
        v3 = qkv[:, 2 * QKV_STRIDE:2 * QKV_STRIDE + D].reshape(B, T, D)

        # --- multi-head self-attention, batched over B; per-head static loop ---
        # 1/sqrt(HD) is already folded into the Wq columns.
        attn2 = None
        for h in range(H):
            sl = slice(h * HD, (h + 1) * HD)
            qh, kh, vh = q3[:, :, sl], k3[:, :, sl], v3[:, :, sl]     # (B, T, HD)
            s = jnp.einsum('btd,bsd->bts', qh, kh,
                           preferred_element_type=jnp.float32) + addmask   # (B, T, T)
            s = s - jnp.max(s, axis=-1, keepdims=True)
            p = jnp.exp(s)
            p = p * pl.reciprocal(jnp.sum(p, axis=-1, keepdims=True), approx=True)
            ctx = jnp.einsum('bts,bsd->btd', p, vh,
                             preferred_element_type=jnp.float32)      # (B, T, HD)
            # Per-head row block of Wo -> accumulate (avoids lane-dim concat).
            part = jnp.dot(ctx.reshape(B * T, HD).astype(MATMUL_DTYPE),
                           wo_ref[li * H + h], preferred_element_type=jnp.float32)
            attn2 = part if attn2 is None else attn2 + part
        attn2 = attn2 + bo_ref[li]

        # --- residual + layernorm 1 (post-norm, like nn.TransformerEncoderLayer)
        x2 = _layer_norm(x2 + attn2, ln1g_ref[li], ln1b_ref[li])

        # --- feed-forward (ReLU) -------------------------------------------------
        h1 = (jnp.dot(x2.astype(MATMUL_DTYPE), w1_ref[li],
                      preferred_element_type=jnp.float32) + b1_ref[li])
        h1 = jnp.maximum(h1, 0.0)
        h2 = (jnp.dot(h1.astype(MATMUL_DTYPE), w2_ref[li],
                      preferred_element_type=jnp.float32) + b2_ref[li])

        # --- residual + layernorm 2 ---------------------------------------------
        x2 = _layer_norm(x2 + h2, ln2g_ref[li], ln2b_ref[li])

    # --- lane-dense (128-wide) output projection; unmasked vector stores --------
    logits = (jnp.dot(x2.astype(MATMUL_DTYPE), fcw_ref[...],
                      preferred_element_type=jnp.float32) + fcb_ref[...])
    o_ref[...] = logits.reshape(B, T, V_PAD)


def run_fused(text2d, text_col, p):
    args = (text2d, text_col, p["emb_pad"], p["pe"],
            p["wqkv"], p["bqkv"], p["wo"], p["bo"],
            p["ln1g"], p["ln1b"], p["w1"], p["b1"], p["w2"], p["b2"],
            p["ln2g"], p["ln2b"], p["fc_w"], p["fc_b"])
    # No grid, no BlockSpecs: every (tiny) operand is a single full-array VMEM
    # block; weights are DMA'd once for the whole forward pass.
    return pl.pallas_call(
        fused_forward_kernel,
        out_shape=jax.ShapeDtypeStruct((B, T, V_PAD), jnp.float32),
    )(*args)


# ------------------------------ params (host-side) ------------------------------
def sinusoidal_pe(t, d):
    pos = jnp.arange(t, dtype=jnp.float32)[:, None]
    div = jnp.exp(jnp.arange(0, d, 2, dtype=jnp.float32) * (-math.log(10000.0) / d))
    pe = jnp.zeros((t, d), jnp.float32)
    pe = pe.at[:, 0::2].set(jnp.sin(pos * div))
    pe = pe.at[:, 1::2].set(jnp.cos(pos * div))
    return pe


def init_params(key):
    def nrm(k, shape):
        return 0.02 * jax.random.normal(k, shape, jnp.float32)

    keys = jax.random.split(key, 2 + N_LAYERS)

    emb = nrm(keys[0], (TEXT_VOCAB, D))
    emb_pad = jnp.zeros((VOCAB_PAD, D), jnp.float32).at[:TEXT_VOCAB].set(emb)

    pe_scale = 1.0                                   # folded into the PE table
    pe_full = jnp.tile(pe_scale * sinusoidal_pe(T, D), (B, 1))   # (B*T, D), row = b*T+t

    fc_w = nrm(keys[1], (D, PHON_VOCAB))
    fc_w = jnp.pad(fc_w, ((0, 0), (0, V_PAD - PHON_VOCAB)))      # lane-dense pad

    params = {
        "emb_pad": emb_pad,                          # f32 (gather via one-hot matmul)
        "pe": pe_full,                               # f32
        "fc_w": fc_w.astype(MATMUL_DTYPE),
        "fc_b": jnp.zeros((1, V_PAD), jnp.float32),
    }

    wqkv, bqkv, wo, bo = [], [], [], []
    ln1g, ln1b, w1, b1, w2, b2, ln2g, ln2b = ([] for _ in range(8))
    scale = 1.0 / math.sqrt(HD)
    for li in range(N_LAYERS):
        lk = jax.random.split(keys[2 + li], 6)
        wq = nrm(lk[0], (D, D)) * scale              # attention scale folded into Wq
        wk = nrm(lk[1], (D, D))
        wv = nrm(lk[2], (D, D))
        # fused QKV weight padded so Q/K/V start at 128-lane boundaries
        wqkv_l = jnp.zeros((D, 3 * QKV_STRIDE), jnp.float32)
        wqkv_l = wqkv_l.at[:, 0 * QKV_STRIDE:0 * QKV_STRIDE + D].set(wq)
        wqkv_l = wqkv_l.at[:, 1 * QKV_STRIDE:1 * QKV_STRIDE + D].set(wk)
        wqkv_l = wqkv_l.at[:, 2 * QKV_STRIDE:2 * QKV_STRIDE + D].set(wv)
        wqkv.append(wqkv_l)
        bqkv.append(jnp.zeros((1, 3 * QKV_STRIDE), jnp.float32))

        wo_l = nrm(lk[3], (D, D))
        for h in range(H):                           # pre-split Wo into per-head row blocks
            wo.append(wo_l[h * HD:(h + 1) * HD, :])
        bo.append(jnp.zeros((1, D), jnp.float32))

        ln1g.append(jnp.ones((1, D), jnp.float32)); ln1b.append(jnp.zeros((1, D), jnp.float32))
        w1.append(nrm(lk[4], (D, DFF))); b1.append(jnp.zeros((1, DFF), jnp.float32))
        w2.append(nrm(lk[5], (DFF, D))); b2.append(jnp.zeros((1, D), jnp.float32))
        ln2g.append(jnp.ones((1, D), jnp.float32)); ln2b.append(jnp.zeros((1, D), jnp.float32))

    stack = lambda xs: jnp.stack(xs, axis=0)         # leading stacked axis
    params.update({
        "wqkv": stack(wqkv).astype(MATMUL_DTYPE),    # (N_LAYERS, D, 3*128)
        "bqkv": stack(bqkv),
        "wo": stack(wo).astype(MATMUL_DTYPE),        # (N_LAYERS*H, HD, D)
        "bo": stack(bo),
        "ln1g": stack(ln1g), "ln1b": stack(ln1b),
        "w1": stack(w1).astype(MATMUL_DTYPE), "b1": stack(b1),
        "w2": stack(w2).astype(MATMUL_DTYPE), "b2": stack(b2),
        "ln2g": stack(ln2g), "ln2b": stack(ln2b),
    })
    return params


# ------------------------------ module-equivalent forward -----------------------
@jax.jit
def wrapper_module_forward(params, text, phonemes=None, start_index=None):
    """Equivalent of WrapperModule.forward: batch = {'text': text, ...} -> model(batch).

    The forward (non-autoregressive) G2P transformer only consumes 'text';
    'phonemes' / 'start_index' are accepted but unused on this path.
    """
    del phonemes, start_index  # unused by the forward transformer path

    text = text.astype(jnp.int32)
    # Row-major (B*T, 1) view of the same buffer (free bitcast) -> in-kernel one-hot.
    text_col = text.reshape(B * T, 1)

    # Entire hot path (embedding + PE + mask + 2 encoder layers + projection) in
    # ONE Pallas kernel; only the final vocab slice stays outside, purely for
    # interface parity with the PyTorch module (consumers can take the padded
    # 128-wide logits directly to avoid it).
    logits_padded = run_fused(text, text_col, params)        # (B, T, V_PAD)
    return logits_padded[:, :, :PHON_VOCAB]                  # (B, T, PHON_VOCAB)


# ----------------------------------- main ----------------------------------------
if __name__ == "__main__":
    key = jax.random.PRNGKey(0)
    pkey, tkey = jax.random.split(key)
    params = init_params(pkey)

    # deterministic token ids in [1, TEXT_VOCAB), with some padding at the end
    text = jax.random.randint(tkey, (B, T), 1, TEXT_VOCAB, dtype=jnp.int32)
    text = text.at[1, -2:].set(PAD_ID)

    logits = wrapper_module_forward(params, text)
    logits = jax.block_until_ready(logits)

    assert logits.shape == (B, T, PHON_VOCAB)
    assert bool(jnp.all(jnp.isfinite(logits)))
    print("KERNEL_OK")
</pallas_src>

<mosaic_0001>
module attributes {stable_mosaic.version = 11 : i64} {
  func.func @fused_forward_kernel(%arg0: memref<2x8xi32, #tpu.memory_space<vmem>>, %arg1: memref<16x1xi32, #tpu.memory_space<vmem>>, %arg2: memref<128x32xf32, #tpu.memory_space<vmem>>, %arg3: memref<16x32xf32, #tpu.memory_space<vmem>>, %arg4: memref<2x32x384xbf16, #tpu.memory_space<vmem>>, %arg5: memref<2x1x384xf32, #tpu.memory_space<vmem>>, %arg6: memref<8x8x32xbf16, #tpu.memory_space<vmem>>, %arg7: memref<2x1x32xf32, #tpu.memory_space<vmem>>, %arg8: memref<2x1x32xf32, #tpu.memory_space<vmem>>, %arg9: memref<2x1x32xf32, #tpu.memory_space<vmem>>, %arg10: memref<2x32x64xbf16, #tpu.memory_space<vmem>>, %arg11: memref<2x1x64xf32, #tpu.memory_space<vmem>>, %arg12: memref<2x64x32xbf16, #tpu.memory_space<vmem>>, %arg13: memref<2x1x32xf32, #tpu.memory_space<vmem>>, %arg14: memref<2x1x32xf32, #tpu.memory_space<vmem>>, %arg15: memref<2x1x32xf32, #tpu.memory_space<vmem>>, %arg16: memref<32x128xbf16, #tpu.memory_space<vmem>>, %arg17: memref<1x128xf32, #tpu.memory_space<vmem>>, %arg18: memref<2x8x128xf32, #tpu.memory_space<vmem>>) attributes {dimension_semantics = [], scalar_prefetch = 0 : i64, scratch_operands = 0 : i64, tpu.core_type = #tpu.core_type<tc>} {
    %0 = tpu.iota {dimensions = array<i32: 1>} : vector<16x128xi32>
    %c0 = arith.constant 0 : index
    %c0_0 = arith.constant 0 : index
    %1 = vector.load %arg1[%c0, %c0_0] : memref<16x1xi32, #tpu.memory_space<vmem>>, vector<16x1xi32>
    %2 = vector.broadcast %1 : vector<16x1xi32> to vector<16x128xi32>
    %3 = arith.cmpi eq, %0, %2 : vector<16x128xi32>
    %cst = arith.constant 1.000000e+00 : f32
    %cst_1 = arith.constant 0.000000e+00 : f32
    %4 = vector.broadcast %cst : f32 to vector<16x128xf32>
    %5 = vector.broadcast %cst_1 : f32 to vector<16x128xf32>
    %6 = arith.select %3, %4, %5 : vector<16x128xi1>, vector<16x128xf32>
    %c0_2 = arith.constant 0 : index
    %c0_3 = arith.constant 0 : index
    %7 = vector.load %arg2[%c0_2, %c0_3] : memref<128x32xf32, #tpu.memory_space<vmem>>, vector<128x32xf32>
    %cst_4 = arith.constant dense<0.000000e+00> : vector<16x32xf32>
    %8 = tpu.matmul %6, %7, %cst_4 {dimension_numbers = #tpu.dot_dimension_numbers<[1], [0], [0], [1], [0, 0, 1, 1], [], []>} : vector<16x128xf32>, vector<128x32xf32>, vector<16x32xf32> -> vector<16x32xf32>
    %c0_5 = arith.constant 0 : index
    %c0_6 = arith.constant 0 : index
    %9 = vector.load %arg3[%c0_5, %c0_6] : memref<16x32xf32, #tpu.memory_space<vmem>>, vector<16x32xf32>
    %10 = arith.addf %8, %9 : vector<16x32xf32>
    %c0_7 = arith.constant 0 : index
    %c0_8 = arith.constant 0 : index
    %11 = vector.load %arg0[%c0_7, %c0_8] : memref<2x8xi32, #tpu.memory_space<vmem>>, vector<2x8xi32>
    %c0_i32 = arith.constant 0 : i32
    %12 = vector.broadcast %c0_i32 : i32 to vector<2x8xi32>
    %13 = arith.cmpi eq, %11, %12 : vector<2x8xi32>
    %cst_9 = arith.constant -1.000000e+09 : f32
    %cst_10 = arith.constant 0.000000e+00 : f32
    %14 = vector.broadcast %cst_9 : f32 to vector<2x8xf32>
    %15 = vector.broadcast %cst_10 : f32 to vector<2x8xf32>
    %16 = arith.select %13, %14, %15 : vector<2x8xi1>, vector<2x8xf32>
    %17 = vector.shape_cast %16 : vector<2x8xf32> to vector<2x1x8xf32>
    %18 = arith.truncf %10 : vector<16x32xf32> to vector<16x32xbf16>
    %c0_11 = arith.constant 0 : index
    %c0_12 = arith.constant 0 : index
    %c0_13 = arith.constant 0 : index
    %19 = vector.load %arg4[%c0_11, %c0_12, %c0_13] : memref<2x32x384xbf16, #tpu.memory_space<vmem>>, vector<1x32x384xbf16>
    %20 = vector.shape_cast %19 : vector<1x32x384xbf16> to vector<32x384xbf16>
    %cst_14 = arith.constant dense<0.000000e+00> : vector<16x384xf32>
    %21 = tpu.matmul %18, %20, %cst_14 {dimension_numbers = #tpu.dot_dimension_numbers<[1], [0], [0], [1], [0, 0, 1, 1], [], []>} : vector<16x32xbf16>, vector<32x384xbf16>, vector<16x384xf32> -> vector<16x384xf32>
    %c0_15 = arith.constant 0 : index
    %c0_16 = arith.constant 0 : index
    %c0_17 = arith.constant 0 : index
    %22 = vector.load %arg5[%c0_15, %c0_16, %c0_17] : memref<2x1x384xf32, #tpu.memory_space<vmem>>, vector<1x1x384xf32>
    %23 = vector.shape_cast %22 : vector<1x1x384xf32> to vector<1x384xf32>
    %24 = vector.broadcast %23 : vector<1x384xf32> to vector<16x384xf32>
    %25 = arith.addf %21, %24 : vector<16x384xf32>
    %26 = vector.extract_strided_slice %25 {offsets = [0, 0], sizes = [16, 32], strides = [1, 1]} : vector<16x384xf32> to vector<16x32xf32>
    %27 = vector.shape_cast %26 : vector<16x32xf32> to vector<2x8x32xf32>
    %28 = vector.extract_strided_slice %25 {offsets = [0, 128], sizes = [16, 32], strides = [1, 1]} : vector<16x384xf32> to vector<16x32xf32>
    %29 = vector.shape_cast %28 : vector<16x32xf32> to vector<2x8x32xf32>
    %30 = vector.extract_strided_slice %25 {offsets = [0, 256], sizes = [16, 32], strides = [1, 1]} : vector<16x384xf32> to vector<16x32xf32>
    %31 = vector.shape_cast %30 : vector<16x32xf32> to vector<2x8x32xf32>
    %32 = vector.extract_strided_slice %27 {offsets = [0, 0, 0], sizes = [2, 8, 8], strides = [1, 1, 1]} : vector<2x8x32xf32> to vector<2x8x8xf32>
    %33 = vector.extract_strided_slice %29 {offsets = [0, 0, 0], sizes = [2, 8, 8], strides = [1, 1, 1]} : vector<2x8x32xf32> to vector<2x8x8xf32>
    %34 = vector.extract_strided_slice %31 {offsets = [0, 0, 0], sizes = [2, 8, 8], strides = [1, 1, 1]} : vector<2x8x32xf32> to vector<2x8x8xf32>
    "tpu.trace_start"() <{level = 10 : i32, message = "btd,bsd->bts"}> : () -> ()
    %cst_18 = arith.constant dense<0.000000e+00> : vector<2x8x8xf32>
    %35 = tpu.matmul %32, %33, %cst_18 {dimension_numbers = #tpu.dot_dimension_numbers<[2], [2], [1], [1], [0, 0, 0, 1, 1, 1], [0], [0]>} : vector<2x8x8xf32>, vector<2x8x8xf32>, vector<2x8x8xf32> -> vector<2x8x8xf32>
    "tpu.trace_stop"() : () -> ()
    %36 = vector.broadcast %17 : vector<2x1x8xf32> to vector<2x8x8xf32>
    %37 = arith.addf %35, %36 : vector<2x8x8xf32>
    %cst_19 = arith.constant dense<0xFF800000> : vector<2x8xf32>
    %38 = vector.multi_reduction <maximumf>, %37, %cst_19 [2] : vector<2x8x8xf32> to vector<2x8xf32>
    %39 = vector.shape_cast %38 : vector<2x8xf32> to vector<2x8x1xf32>
    %40 = vector.broadcast %39 : vector<2x8x1xf32> to vector<2x8x8xf32>
    %41 = arith.subf %37, %40 : vector<2x8x8xf32>
    %42 = math.exp %41 : vector<2x8x8xf32>
    %cst_20 = arith.constant dense<0.000000e+00> : vector<2x8xf32>
    %43 = vector.multi_reduction <add>, %42, %cst_20 [2] : vector<2x8x8xf32> to vector<2x8xf32>
    %44 = vector.shape_cast %43 : vector<2x8xf32> to vector<2x8x1xf32>
    %45 = tpu.reciprocal %44 {approx = true} : vector<2x8x1xf32> -> vector<2x8x1xf32>
    %46 = vector.broadcast %45 : vector<2x8x1xf32> to vector<2x8x8xf32>
    %47 = arith.mulf %42, %46 : vector<2x8x8xf32>
    "tpu.trace_start"() <{level = 10 : i32, message = "bts,bsd->btd"}> : () -> ()
    %cst_21 = arith.constant dense<0.000000e+00> : vector<2x8x8xf32>
    %48 = tpu.matmul %47, %34, %cst_21 {dimension_numbers = #tpu.dot_dimension_numbers<[2], [1], [1], [2], [0, 0, 0, 1, 1, 2], [0], [0]>} : vector<2x8x8xf32>, vector<2x8x8xf32>, vector<2x8x8xf32> -> vector<2x8x8xf32>
    "tpu.trace_stop"() : () -> ()
    %49 = vector.shape_cast %48 : vector<2x8x8xf32> to vector<16x8xf32>
    %50 = arith.truncf %49 : vector<16x8xf32> to vector<16x8xbf16>
    %c0_22 = arith.constant 0 : index
    %c0_23 = arith.constant 0 : index
    %c0_24 = arith.constant 0 : index
    %51 = vector.load %arg6[%c0_22, %c0_23, %c0_24] : memref<8x8x32xbf16, #tpu.memory_space<vmem>>, vector<1x8x32xbf16>
    %52 = vector.shape_cast %51 : vector<1x8x32xbf16> to vector<8x32xbf16>
    %cst_25 = arith.constant dense<0.000000e+00> : vector<16x32xf32>
    %53 = tpu.matmul %50, %52, %cst_25 {dimension_numbers = #tpu.dot_dimension_numbers<[1], [0], [0], [1], [0, 0, 1, 1], [], []>} : vector<16x8xbf16>, vector<8x32xbf16>, vector<16x32xf32> -> vector<16x32xf32>
    %54 = vector.extract_strided_slice %27 {offsets = [0, 0, 8], sizes = [2, 8, 8], strides = [1, 1, 1]} : vector<2x8x32xf32> to vector<2x8x8xf32>
    %55 = vector.extract_strided_slice %29 {offsets = [0, 0, 8], sizes = [2, 8, 8], strides = [1, 1, 1]} : vector<2x8x32xf32> to vector<2x8x8xf32>
    %56 = vector.extract_strided_slice %31 {offsets = [0, 0, 8], sizes = [2, 8, 8], strides = [1, 1, 1]} : vector<2x8x32xf32> to vector<2x8x8xf32>
    "tpu.trace_start"() <{level = 10 : i32, message = "btd,bsd->bts"}> : () -> ()
    %cst_26 = arith.constant dense<0.000000e+00> : vector<2x8x8xf32>
    %57 = tpu.matmul %54, %55, %cst_26 {dimension_numbers = #tpu.dot_dimension_numbers<[2], [2], [1], [1], [0, 0, 0, 1, 1, 1], [0], [0]>} : vector<2x8x8xf32>, vector<2x8x8xf32>, vector<2x8x8xf32> -> vector<2x8x8xf32>
    "tpu.trace_stop"() : () -> ()
    %58 = vector.broadcast %17 : vector<2x1x8xf32> to vector<2x8x8xf32>
    %59 = arith.addf %57, %58 : vector<2x8x8xf32>
    %cst_27 = arith.constant dense<0xFF800000> : vector<2x8xf32>
    %60 = vector.multi_reduction <maximumf>, %59, %cst_27 [2] : vector<2x8x8xf32> to vector<2x8xf32>
    %61 = vector.shape_cast %60 : vector<2x8xf32> to vector<2x8x1xf32>
    %62 = vector.broadcast %61 : vector<2x8x1xf32> to vector<2x8x8xf32>
    %63 = arith.subf %59, %62 : vector<2x8x8xf32>
    %64 = math.exp %63 : vector<2x8x8xf32>
    %cst_28 = arith.constant dense<0.000000e+00> : vector<2x8xf32>
    %65 = vector.multi_reduction <add>, %64, %cst_28 [2] : vector<2x8x8xf32> to vector<2x8xf32>
    %66 = vector.shape_cast %65 : vector<2x8xf32> to vector<2x8x1xf32>
    %67 = tpu.reciprocal %66 {approx = true} : vector<2x8x1xf32> -> vector<2x8x1xf32>
    %68 = vector.broadcast %67 : vector<2x8x1xf32> to vector<2x8x8xf32>
    %69 = arith.mulf %64, %68 : vector<2x8x8xf32>
    "tpu.trace_start"() <{level = 10 : i32, message = "bts,bsd->btd"}> : () -> ()
    %cst_29 = arith.constant dense<0.000000e+00> : vector<2x8x8xf32>
    %70 = tpu.matmul %69, %56, %cst_29 {dimension_numbers = #tpu.dot_dimension_numbers<[2], [1], [1], [2], [0, 0, 0, 1, 1, 2], [0], [0]>} : vector<2x8x8xf32>, vector<2x8x8xf32>, vector<2x8x8xf32> -> vector<2x8x8xf32>
    "tpu.trace_stop"() : () -> ()
    %71 = vector.shape_cast %70 : vector<2x8x8xf32> to vector<16x8xf32>
    %72 = arith.truncf %71 : vector<16x8xf32> to vector<16x8xbf16>
    %c1 = arith.constant 1 : index
    %c0_30 = arith.constant 0 : index
    %c0_31 = arith.constant 0 : index
    %73 = vector.load %arg6[%c1, %c0_30, %c0_31] : memref<8x8x32xbf16, #tpu.memory_space<vmem>>, vector<1x8x32xbf16>
    %74 = vector.shape_cast %73 : vector<1x8x32xbf16> to vector<8x32xbf16>
    %cst_32 = arith.constant dense<0.000000e+00> : vector<16x32xf32>
    %75 = tpu.matmul %72, %74, %cst_32 {dimension_numbers = #tpu.dot_dimension_numbers<[1], [0], [0], [1], [0, 0, 1, 1], [], []>} : vector<16x8xbf16>, vector<8x32xbf16>, vector<16x32xf32> -> vector<16x32xf32>
    %76 = arith.addf %53, %75 : vector<16x32xf32>
    %77 = vector.extract_strided_slice %27 {offsets = [0, 0, 16], sizes = [2, 8, 8], strides = [1, 1, 1]} : vector<2x8x32xf32> to vector<2x8x8xf32>
    %78 = vector.extract_strided_slice %29 {offsets = [0, 0, 16], sizes = [2, 8, 8], strides = [1, 1, 1]} : vector<2x8x32xf32> to vector<2x8x8xf32>
    %79 = vector.extract_strided_slice %31 {offsets = [0, 0, 16], sizes = [2, 8, 8], strides = [1, 1, 1]} : vector<2x8x32xf32> to vector<2x8x8xf32>
    "tpu.trace_start"() <{level = 10 : i32, message = "btd,bsd->bts"}> : () -> ()
    %cst_33 = arith.constant dense<0.000000e+00> : vector<2x8x8xf32>
    %80 = tpu.matmul %77, %78, %cst_33 {dimension_numbers = #tpu.dot_dimension_numbers<[2], [2], [1], [1], [0, 0, 0, 1, 1, 1], [0], [0]>} : vector<2x8x8xf32>, vector<2x8x8xf32>, vector<2x8x8xf32> -> vector<2x8x8xf32>
    "tpu.trace_stop"() : () -> ()
    %81 = vector.broadcast %17 : vector<2x1x8xf32> to vector<2x8x8xf32>
    %82 = arith.addf %80, %81 : vector<2x8x8xf32>
    %cst_34 = arith.constant dense<0xFF800000> : vector<2x8xf32>
    %83 = vector.multi_reduction <maximumf>, %82, %cst_34 [2] : vector<2x8x8xf32> to vector<2x8xf32>
    %84 = vector.shape_cast %83 : vector<2x8xf32> to vector<2x8x1xf32>
    %85 = vector.broadcast %84 : vector<2x8x1xf32> to vector<2x8x8xf32>
    %86 = arith.subf %82, %85 : vector<2x8x8xf32>
    %87 = math.exp %86 : vector<2x8x8xf32>
    %cst_35 = arith.constant dense<0.000000e+00> : vector<2x8xf32>
    %88 = vector.multi_reduction <add>, %87, %cst_35 [2] : vector<2x8x8xf32> to vector<2x8xf32>
    %89 = vector.shape_cast %88 : vector<2x8xf32> to vector<2x8x1xf32>
    %90 = tpu.reciprocal %89 {approx = true} : vector<2x8x1xf32> -> vector<2x8x1xf32>
    %91 = vector.broadcast %90 : vector<2x8x1xf32> to vector<2x8x8xf32>
    %92 = arith.mulf %87, %91 : vector<2x8x8xf32>
    "tpu.trace_start"() <{level = 10 : i32, message = "bts,bsd->btd"}> : () -> ()
    %cst_36 = arith.constant dense<0.000000e+00> : vector<2x8x8xf32>
    %93 = tpu.matmul %92, %79, %cst_36 {dimension_numbers = #tpu.dot_dimension_numbers<[2], [1], [1], [2], [0, 0, 0, 1, 1, 2], [0], [0]>} : vector<2x8x8xf32>, vector<2x8x8xf32>, vector<2x8x8xf32> -> vector<2x8x8xf32>
    "tpu.trace_stop"() : () -> ()
    %94 = vector.shape_cast %93 : vector<2x8x8xf32> to vector<16x8xf32>
    %95 = arith.truncf %94 : vector<16x8xf32> to vector<16x8xbf16>
    %c2 = arith.constant 2 : index
    %c0_37 = arith.constant 0 : index
    %c0_38 = arith.constant 0 : index
    %96 = vector.load %arg6[%c2, %c0_37, %c0_38] : memref<8x8x32xbf16, #tpu.memory_space<vmem>>, vector<1x8x32xbf16>
    %97 = vector.shape_cast %96 : vector<1x8x32xbf16> to vector<8x32xbf16>
    %cst_39 = arith.constant dense<0.000000e+00> : vector<16x32xf32>
    %98 = tpu.matmul %95, %97, %cst_39 {dimension_numbers = #tpu.dot_dimension_numbers<[1], [0], [0], [1], [0, 0, 1, 1], [], []>} : vector<16x8xbf16>, vector<8x32xbf16>, vector<16x32xf32> -> vector<16x32xf32>
    %99 = arith.addf %76, %98 : vector<16x32xf32>
    %100 = vector.extract_strided_slice %27 {offsets = [0, 0, 24], sizes = [2, 8, 8], strides = [1, 1, 1]} : vector<2x8x32xf32> to vector<2x8x8xf32>
    %101 = vector.extract_strided_slice %29 {offsets = [0, 0, 24], sizes = [2, 8, 8], strides = [1, 1, 1]} : vector<2x8x32xf32> to vector<2x8x8xf32>
    %102 = vector.extract_strided_slice %31 {offsets = [0, 0, 24], sizes = [2, 8, 8], strides = [1, 1, 1]} : vector<2x8x32xf32> to vector<2x8x8xf32>
    "tpu.trace_start"() <{level = 10 : i32, message = "btd,bsd->bts"}> : () -> ()
    %cst_40 = arith.constant dense<0.000000e+00> : vector<2x8x8xf32>
    %103 = tpu.matmul %100, %101, %cst_40 {dimension_numbers = #tpu.dot_dimension_numbers<[2], [2], [1], [1], [0, 0, 0, 1, 1, 1], [0], [0]>} : vector<2x8x8xf32>, vector<2x8x8xf32>, vector<2x8x8xf32> -> vector<2x8x8xf32>
    "tpu.trace_stop"() : () -> ()
    %104 = vector.broadcast %17 : vector<2x1x8xf32> to vector<2x8x8xf32>
    %105 = arith.addf %103, %104 : vector<2x8x8xf32>
    %cst_41 = arith.constant dense<0xFF800000> : vector<2x8xf32>
    %106 = vector.multi_reduction <maximumf>, %105, %cst_41 [2] : vector<2x8x8xf32> to vector<2x8xf32>
    %107 = vector.shape_cast %106 : vector<2x8xf32> to vector<2x8x1xf32>
    %108 = vector.broadcast %107 : vector<2x8x1xf32> to vector<2x8x8xf32>
    %109 = arith.subf %105, %108 : vector<2x8x8xf32>
    %110 = math.exp %109 : vector<2x8x8xf32>
    %cst_42 = arith.constant dense<0.000000e+00> : vector<2x8xf32>
    %111 = vector.multi_reduction <add>, %110, %cst_42 [2] : vector<2x8x8xf32> to vector<2x8xf32>
    %112 = vector.shape_cast %111 : vector<2x8xf32> to vector<2x8x1xf32>
    %113 = tpu.reciprocal %112 {approx = true} : vector<2x8x1xf32> -> vector<2x8x1xf32>
    %114 = vector.broadcast %113 : vector<2x8x1xf32> to vector<2x8x8xf32>
    %115 = arith.mulf %110, %114 : vector<2x8x8xf32>
    "tpu.trace_start"() <{level = 10 : i32, message = "bts,bsd->btd"}> : () -> ()
    %cst_43 = arith.constant dense<0.000000e+00> : vector<2x8x8xf32>
    %116 = tpu.matmul %115, %102, %cst_43 {dimension_numbers = #tpu.dot_dimension_numbers<[2], [1], [1], [2], [0, 0, 0, 1, 1, 2], [0], [0]>} : vector<2x8x8xf32>, vector<2x8x8xf32>, vector<2x8x8xf32> -> vector<2x8x8xf32>
    "tpu.trace_stop"() : () -> ()
    %117 = vector.shape_cast %116 : vector<2x8x8xf32> to vector<16x8xf32>
    %118 = arith.truncf %117 : vector<16x8xf32> to vector<16x8xbf16>
    %c3 = arith.constant 3 : index
    %c0_44 = arith.constant 0 : index
    %c0_45 = arith.constant 0 : index
    %119 = vector.load %arg6[%c3, %c0_44, %c0_45] : memref<8x8x32xbf16, #tpu.memory_space<vmem>>, vector<1x8x32xbf16>
    %120 = vector.shape_cast %119 : vector<1x8x32xbf16> to vector<8x32xbf16>
    %cst_46 = arith.constant dense<0.000000e+00> : vector<16x32xf32>
    %121 = tpu.matmul %118, %120, %cst_46 {dimension_numbers = #tpu.dot_dimension_numbers<[1], [0], [0], [1], [0, 0, 1, 1], [], []>} : vector<16x8xbf16>, vector<8x32xbf16>, vector<16x32xf32> -> vector<16x32xf32>
    %122 = arith.addf %99, %121 : vector<16x32xf32>
    %c0_47 = arith.constant 0 : index
    %c0_48 = arith.constant 0 : index
    %c0_49 = arith.constant 0 : index
    %123 = vector.load %arg7[%c0_47, %c0_48, %c0_49] : memref<2x1x32xf32, #tpu.memory_space<vmem>>, vector<1x1x32xf32>
    %124 = vector.shape_cast %123 : vector<1x1x32xf32> to vector<1x32xf32>
    %125 = vector.broadcast %124 : vector<1x32xf32> to vector<16x32xf32>
    %126 = arith.addf %122, %125 : vector<16x32xf32>
    %127 = arith.addf %10, %126 : vector<16x32xf32>
    %c0_50 = arith.constant 0 : index
    %c0_51 = arith.constant 0 : index
    %c0_52 = arith.constant 0 : index
    %128 = vector.load %arg8[%c0_50, %c0_51, %c0_52] : memref<2x1x32xf32, #tpu.memory_space<vmem>>, vector<1x1x32xf32>
    %129 = vector.shape_cast %128 : vector<1x1x32xf32> to vector<1x32xf32>
    %c0_53 = arith.constant 0 : index
    %c0_54 = arith.constant 0 : index
    %c0_55 = arith.constant 0 : index
    %130 = vector.load %arg9[%c0_53, %c0_54, %c0_55] : memref<2x1x32xf32, #tpu.memory_space<vmem>>, vector<1x1x32xf32>
    %131 = vector.shape_cast %130 : vector<1x1x32xf32> to vector<1x32xf32>
    %cst_56 = arith.constant dense<0.000000e+00> : vector<16xf32>
    %132 = vector.multi_reduction <add>, %127, %cst_56 [1] : vector<16x32xf32> to vector<16xf32>
    %133 = vector.shape_cast %132 : vector<16xf32> to vector<16x1xf32>
    %cst_57 = arith.constant 3.200000e+01 : f32
    %134 = vector.broadcast %cst_57 : f32 to vector<16x1xf32>
    %135 = arith.divf %133, %134 : vector<16x1xf32>
    %136 = vector.broadcast %135 : vector<16x1xf32> to vector<16x32xf32>
    %137 = arith.subf %127, %136 : vector<16x32xf32>
    %138 = arith.mulf %137, %137 : vector<16x32xf32>
    %cst_58 = arith.constant dense<0.000000e+00> : vector<16xf32>
    %139 = vector.multi_reduction <add>, %138, %cst_58 [1] : vector<16x32xf32> to vector<16xf32>
    %140 = vector.shape_cast %139 : vector<16xf32> to vector<16x1xf32>
    %cst_59 = arith.constant 3.200000e+01 : f32
    %141 = vector.broadcast %cst_59 : f32 to vector<16x1xf32>
    %142 = arith.divf %140, %141 : vector<16x1xf32>
    %143 = vector.broadcast %135 : vector<16x1xf32> to vector<16x32xf32>
    %144 = arith.subf %127, %143 : vector<16x32xf32>
    %cst_60 = arith.constant 9.99999974E-6 : f32
    %145 = vector.broadcast %cst_60 : f32 to vector<16x1xf32>
    %146 = arith.addf %142, %145 : vector<16x1xf32>
    %147 = math.rsqrt %146 : vector<16x1xf32>
    %148 = vector.broadcast %147 : vector<16x1xf32> to vector<16x32xf32>
    %149 = arith.mulf %144, %148 : vector<16x32xf32>
    %150 = vector.broadcast %129 : vector<1x32xf32> to vector<16x32xf32>
    %151 = arith.mulf %149, %150 : vector<16x32xf32>
    %152 = vector.broadcast %131 : vector<1x32xf32> to vector<16x32xf32>
    %153 = arith.addf %151, %152 : vector<16x32xf32>
    %154 = arith.truncf %153 : vector<16x32xf32> to vector<16x32xbf16>
    %c0_61 = arith.constant 0 : index
    %c0_62 = arith.constant 0 : index
    %c0_63 = arith.constant 0 : index
    %155 = vector.load %arg10[%c0_61, %c0_62, %c0_63] : memref<2x32x64xbf16, #tpu.memory_space<vmem>>, vector<1x32x64xbf16>
    %156 = vector.shape_cast %155 : vector<1x32x64xbf16> to vector<32x64xbf16>
    %cst_64 = arith.constant dense<0.000000e+00> : vector<16x64xf32>
    %157 = tpu.matmul %154, %156, %cst_64 {dimension_numbers = #tpu.dot_dimension_numbers<[1], [0], [0], [1], [0, 0, 1, 1], [], []>} : vector<16x32xbf16>, vector<32x64xbf16>, vector<16x64xf32> -> vector<16x64xf32>
    %c0_65 = arith.constant 0 : index
    %c0_66 = arith.constant 0 : index
    %c0_67 = arith.constant 0 : index
    %158 = vector.load %arg11[%c0_65, %c0_66, %c0_67] : memref<2x1x64xf32, #tpu.memory_space<vmem>>, vector<1x1x64xf32>
    %159 = vector.shape_cast %158 : vector<1x1x64xf32> to vector<1x64xf32>
    %160 = vector.broadcast %159 : vector<1x64xf32> to vector<16x64xf32>
    %161 = arith.addf %157, %160 : vector<16x64xf32>
    %cst_68 = arith.constant 0.000000e+00 : f32
    %162 = vector.broadcast %cst_68 : f32 to vector<16x64xf32>
    %163 = arith.maximumf %161, %162 : vector<16x64xf32>
    %164 = arith.truncf %163 : vector<16x64xf32> to vector<16x64xbf16>
    %c0_69 = arith.constant 0 : index
    %c0_70 = arith.constant 0 : index
    %c0_71 = arith.constant 0 : index
    %165 = vector.load %arg12[%c0_69, %c0_70, %c0_71] : memref<2x64x32xbf16, #tpu.memory_space<vmem>>, vector<1x64x32xbf16>
    %166 = vector.shape_cast %165 : vector<1x64x32xbf16> to vector<64x32xbf16>
    %cst_72 = arith.constant dense<0.000000e+00> : vector<16x32xf32>
    %167 = tpu.matmul %164, %166, %cst_72 {dimension_numbers = #tpu.dot_dimension_numbers<[1], [0], [0], [1], [0, 0, 1, 1], [], []>} : vector<16x64xbf16>, vector<64x32xbf16>, vector<16x32xf32> -> vector<16x32xf32>
    %c0_73 = arith.constant 0 : index
    %c0_74 = arith.constant 0 : index
    %c0_75 = arith.constant 0 : index
    %168 = vector.load %arg13[%c0_73, %c0_74, %c0_75] : memref<2x1x32xf32, #tpu.memory_space<vmem>>, vector<1x1x32xf32>
    %169 = vector.shape_cast %168 : vector<1x1x32xf32> to vector<1x32xf32>
    %170 = vector.broadcast %169 : vector<1x32xf32> to vector<16x32xf32>
    %171 = arith.addf %167, %170 : vector<16x32xf32>
    %172 = arith.addf %153, %171 : vector<16x32xf32>
    %c0_76 = arith.constant 0 : index
    %c0_77 = arith.constant 0 : index
    %c0_78 = arith.constant 0 : index
    %173 = vector.load %arg14[%c0_76, %c0_77, %c0_78] : memref<2x1x32xf32, #tpu.memory_space<vmem>>, vector<1x1x32xf32>
    %174 = vector.shape_cast %173 : vector<1x1x32xf32> to vector<1x32xf32>
    %c0_79 = arith.constant 0 : index
    %c0_80 = arith.constant 0 : index
    %c0_81 = arith.constant 0 : index
    %175 = vector.load %arg15[%c0_79, %c0_80, %c0_81] : memref<2x1x32xf32, #tpu.memory_space<vmem>>, vector<1x1x32xf32>
    %176 = vector.shape_cast %175 : vector<1x1x32xf32> to vector<1x32xf32>
    %cst_82 = arith.constant dense<0.000000e+00> : vector<16xf32>
    %177 = vector.multi_reduction <add>, %172, %cst_82 [1] : vector<16x32xf32> to vector<16xf32>
    %178 = vector.shape_cast %177 : vector<16xf32> to vector<16x1xf32>
    %cst_83 = arith.constant 3.200000e+01 : f32
    %179 = vector.broadcast %cst_83 : f32 to vector<16x1xf32>
    %180 = arith.divf %178, %179 : vector<16x1xf32>
    %181 = vector.broadcast %180 : vector<16x1xf32> to vector<16x32xf32>
    %182 = arith.subf %172, %181 : vector<16x32xf32>
    %183 = arith.mulf %182, %182 : vector<16x32xf32>
    %cst_84 = arith.constant dense<0.000000e+00> : vector<16xf32>
    %184 = vector.multi_reduction <add>, %183, %cst_84 [1] : vector<16x32xf32> to vector<16xf32>
    %185 = vector.shape_cast %184 : vector<16xf32> to vector<16x1xf32>
    %cst_85 = arith.constant 3.200000e+01 : f32
    %186 = vector.broadcast %cst_85 : f32 to vector<16x1xf32>
    %187 = arith.divf %185, %186 : vector<16x1xf32>
    %188 = vector.broadcast %180 : vector<16x1xf32> to vector<16x32xf32>
    %189 = arith.subf %172, %188 : vector<16x32xf32>
    %cst_86 = arith.constant 9.99999974E-6 : f32
    %190 = vector.broadcast %cst_86 : f32 to vector<16x1xf32>
    %191 = arith.addf %187, %190 : vector<16x1xf32>
    %192 = math.rsqrt %191 : vector<16x1xf32>
    %193 = vector.broadcast %192 : vector<16x1xf32> to vector<16x32xf32>
    %194 = arith.mulf %189, %193 : vector<16x32xf32>
    %195 = vector.broadcast %174 : vector<1x32xf32> to vector<16x32xf32>
    %196 = arith.mulf %194, %195 : vector<16x32xf32>
    %197 = vector.broadcast %176 : vector<1x32xf32> to vector<16x32xf32>
    %198 = arith.addf %196, %197 : vector<16x32xf32>
    %199 = arith.truncf %198 : vector<16x32xf32> to vector<16x32xbf16>
    %c1_87 = arith.constant 1 : index
    %c0_88 = arith.constant 0 : index
    %c0_89 = arith.constant 0 : index
    %200 = vector.load %arg4[%c1_87, %c0_88, %c0_89] : memref<2x32x384xbf16, #tpu.memory_space<vmem>>, vector<1x32x384xbf16>
    %201 = vector.shape_cast %200 : vector<1x32x384xbf16> to vector<32x384xbf16>
    %cst_90 = arith.constant dense<0.000000e+00> : vector<16x384xf32>
    %202 = tpu.matmul %199, %201, %cst_90 {dimension_numbers = #tpu.dot_dimension_numbers<[1], [0], [0], [1], [0, 0, 1, 1], [], []>} : vector<16x32xbf16>, vector<32x384xbf16>, vector<16x384xf32> -> vector<16x384xf32>
    %c1_91 = arith.constant 1 : index
    %c0_92 = arith.constant 0 : index
    %c0_93 = arith.constant 0 : index
    %203 = vector.load %arg5[%c1_91, %c0_92, %c0_93] : memref<2x1x384xf32, #tpu.memory_space<vmem>>, vector<1x1x384xf32>
    %204 = vector.shape_cast %203 : vector<1x1x384xf32> to vector<1x384xf32>
    %205 = vector.broadcast %204 : vector<1x384xf32> to vector<16x384xf32>
    %206 = arith.addf %202, %205 : vector<16x384xf32>
    %207 = vector.extract_strided_slice %206 {offsets = [0, 0], sizes = [16, 32], strides = [1, 1]} : vector<16x384xf32> to vector<16x32xf32>
    %208 = vector.shape_cast %207 : vector<16x32xf32> to vector<2x8x32xf32>
    %209 = vector.extract_strided_slice %206 {offsets = [0, 128], sizes = [16, 32], strides = [1, 1]} : vector<16x384xf32> to vector<16x32xf32>
    %210 = vector.shape_cast %209 : vector<16x32xf32> to vector<2x8x32xf32>
    %211 = vector.extract_strided_slice %206 {offsets = [0, 256], sizes = [16, 32], strides = [1, 1]} : vector<16x384xf32> to vector<16x32xf32>
    %212 = vector.shape_cast %211 : vector<16x32xf32> to vector<2x8x32xf32>
    %213 = vector.extract_strided_slice %208 {offsets = [0, 0, 0], sizes = [2, 8, 8], strides = [1, 1, 1]} : vector<2x8x32xf32> to vector<2x8x8xf32>
    %214 = vector.extract_strided_slice %210 {offsets = [0, 0, 0], sizes = [2, 8, 8], strides = [1, 1, 1]} : vector<2x8x32xf32> to vector<2x8x8xf32>
    %215 = vector.extract_strided_slice %212 {offsets = [0, 0, 0], sizes = [2, 8, 8], strides = [1, 1, 1]} : vector<2x8x32xf32> to vector<2x8x8xf32>
    "tpu.trace_start"() <{level = 10 : i32, message = "btd,bsd->bts"}> : () -> ()
    %cst_94 = arith.constant dense<0.000000e+00> : vector<2x8x8xf32>
    %216 = tpu.matmul %213, %214, %cst_94 {dimension_numbers = #tpu.dot_dimension_numbers<[2], [2], [1], [1], [0, 0, 0, 1, 1, 1], [0], [0]>} : vector<2x8x8xf32>, vector<2x8x8xf32>, vector<2x8x8xf32> -> vector<2x8x8xf32>
    "tpu.trace_stop"() : () -> ()
    %217 = vector.broadcast %17 : vector<2x1x8xf32> to vector<2x8x8xf32>
    %218 = arith.addf %216, %217 : vector<2x8x8xf32>
    %cst_95 = arith.constant dense<0xFF800000> : vector<2x8xf32>
    %219 = vector.multi_reduction <maximumf>, %218, %cst_95 [2] : vector<2x8x8xf32> to vector<2x8xf32>
    %220 = vector.shape_cast %219 : vector<2x8xf32> to vector<2x8x1xf32>
    %221 = vector.broadcast %220 : vector<2x8x1xf32> to vector<2x8x8xf32>
    %222 = arith.subf %218, %221 : vector<2x8x8xf32>
    %223 = math.exp %222 : vector<2x8x8xf32>
    %cst_96 = arith.constant dense<0.000000e+00> : vector<2x8xf32>
    %224 = vector.multi_reduction <add>, %223, %cst_96 [2] : vector<2x8x8xf32> to vector<2x8xf32>
    %225 = vector.shape_cast %224 : vector<2x8xf32> to vector<2x8x1xf32>
    %226 = tpu.reciprocal %225 {approx = true} : vector<2x8x1xf32> -> vector<2x8x1xf32>
    %227 = vector.broadcast %226 : vector<2x8x1xf32> to vector<2x8x8xf32>
    %228 = arith.mulf %223, %227 : vector<2x8x8xf32>
    "tpu.trace_start"() <{level = 10 : i32, message = "bts,bsd->btd"}> : () -> ()
    %cst_97 = arith.constant dense<0.000000e+00> : vector<2x8x8xf32>
    %229 = tpu.matmul %228, %215, %cst_97 {dimension_numbers = #tpu.dot_dimension_numbers<[2], [1], [1], [2], [0, 0, 0, 1, 1, 2], [0], [0]>} : vector<2x8x8xf32>, vector<2x8x8xf32>, vector<2x8x8xf32> -> vector<2x8x8xf32>
    "tpu.trace_stop"() : () -> ()
    %230 = vector.shape_cast %229 : vector<2x8x8xf32> to vector<16x8xf32>
    %231 = arith.truncf %230 : vector<16x8xf32> to vector<16x8xbf16>
    %c4 = arith.constant 4 : index
    %c0_98 = arith.constant 0 : index
    %c0_99 = arith.constant 0 : index
    %232 = vector.load %arg6[%c4, %c0_98, %c0_99] : memref<8x8x32xbf16, #tpu.memory_space<vmem>>, vector<1x8x32xbf16>
    %233 = vector.shape_cast %232 : vector<1x8x32xbf16> to vector<8x32xbf16>
    %cst_100 = arith.constant dense<0.000000e+00> : vector<16x32xf32>
    %234 = tpu.matmul %231, %233, %cst_100 {dimension_numbers = #tpu.dot_dimension_numbers<[1], [0], [0], [1], [0, 0, 1, 1], [], []>} : vector<16x8xbf16>, vector<8x32xbf16>, vector<16x32xf32> -> vector<16x32xf32>
    %235 = vector.extract_strided_slice %208 {offsets = [0, 0, 8], sizes = [2, 8, 8], strides = [1, 1, 1]} : vector<2x8x32xf32> to vector<2x8x8xf32>
    %236 = vector.extract_strided_slice %210 {offsets = [0, 0, 8], sizes = [2, 8, 8], strides = [1, 1, 1]} : vector<2x8x32xf32> to vector<2x8x8xf32>
    %237 = vector.extract_strided_slice %212 {offsets = [0, 0, 8], sizes = [2, 8, 8], strides = [1, 1, 1]} : vector<2x8x32xf32> to vector<2x8x8xf32>
    "tpu.trace_start"() <{level = 10 : i32, message = "btd,bsd->bts"}> : () -> ()
    %cst_101 = arith.constant dense<0.000000e+00> : vector<2x8x8xf32>
    %238 = tpu.matmul %235, %236, %cst_101 {dimension_numbers = #tpu.dot_dimension_numbers<[2], [2], [1], [1], [0, 0, 0, 1, 1, 1], [0], [0]>} : vector<2x8x8xf32>, vector<2x8x8xf32>, vector<2x8x8xf32> -> vector<2x8x8xf32>
    "tpu.trace_stop"() : () -> ()
    %239 = vector.broadcast %17 : vector<2x1x8xf32> to vector<2x8x8xf32>
    %240 = arith.addf %238, %239 : vector<2x8x8xf32>
    %cst_102 = arith.constant dense<0xFF800000> : vector<2x8xf32>
    %241 = vector.multi_reduction <maximumf>, %240, %cst_102 [2] : vector<2x8x8xf32> to vector<2x8xf32>
    %242 = vector.shape_cast %241 : vector<2x8xf32> to vector<2x8x1xf32>
    %243 = vector.broadcast %242 : vector<2x8x1xf32> to vector<2x8x8xf32>
    %244 = arith.subf %240, %243 : vector<2x8x8xf32>
    %245 = math.exp %244 : vector<2x8x8xf32>
    %cst_103 = arith.constant dense<0.000000e+00> : vector<2x8xf32>
    %246 = vector.multi_reduction <add>, %245, %cst_103 [2] : vector<2x8x8xf32> to vector<2x8xf32>
    %247 = vector.shape_cast %246 : vector<2x8xf32> to vector<2x8x1xf32>
    %248 = tpu.reciprocal %247 {approx = true} : vector<2x8x1xf32> -> vector<2x8x1xf32>
    %249 = vector.broadcast %248 : vector<2x8x1xf32> to vector<2x8x8xf32>
    %250 = arith.mulf %245, %249 : vector<2x8x8xf32>
    "tpu.trace_start"() <{level = 10 : i32, message = "bts,bsd->btd"}> : () -> ()
    %cst_104 = arith.constant dense<0.000000e+00> : vector<2x8x8xf32>
    %251 = tpu.matmul %250, %237, %cst_104 {dimension_numbers = #tpu.dot_dimension_numbers<[2], [1], [1], [2], [0, 0, 0, 1, 1, 2], [0], [0]>} : vector<2x8x8xf32>, vector<2x8x8xf32>, vector<2x8x8xf32> -> vector<2x8x8xf32>
    "tpu.trace_stop"() : () -> ()
    %252 = vector.shape_cast %251 : vector<2x8x8xf32> to vector<16x8xf32>
    %253 = arith.truncf %252 : vector<16x8xf32> to vector<16x8xbf16>
    %c5 = arith.constant 5 : index
    %c0_105 = arith.constant 0 : index
    %c0_106 = arith.constant 0 : index
    %254 = vector.load %arg6[%c5, %c0_105, %c0_106] : memref<8x8x32xbf16, #tpu.memory_space<vmem>>, vector<1x8x32xbf16>
    %255 = vector.shape_cast %254 : vector<1x8x32xbf16> to vector<8x32xbf16>
    %cst_107 = arith.constant dense<0.000000e+00> : vector<16x32xf32>
    %256 = tpu.matmul %253, %255, %cst_107 {dimension_numbers = #tpu.dot_dimension_numbers<[1], [0], [0], [1], [0, 0, 1, 1], [], []>} : vector<16x8xbf16>, vector<8x32xbf16>, vector<16x32xf32> -> vector<16x32xf32>
    %257 = arith.addf %234, %256 : vector<16x32xf32>
    %258 = vector.extract_strided_slice %208 {offsets = [0, 0, 16], sizes = [2, 8, 8], strides = [1, 1, 1]} : vector<2x8x32xf32> to vector<2x8x8xf32>
    %259 = vector.extract_strided_slice %210 {offsets = [0, 0, 16], sizes = [2, 8, 8], strides = [1, 1, 1]} : vector<2x8x32xf32> to vector<2x8x8xf32>
    %260 = vector.extract_strided_slice %212 {offsets = [0, 0, 16], sizes = [2, 8, 8], strides = [1, 1, 1]} : vector<2x8x32xf32> to vector<2x8x8xf32>
    "tpu.trace_start"() <{level = 10 : i32, message = "btd,bsd->bts"}> : () -> ()
    %cst_108 = arith.constant dense<0.000000e+00> : vector<2x8x8xf32>
    %261 = tpu.matmul %258, %259, %cst_108 {dimension_numbers = #tpu.dot_dimension_numbers<[2], [2], [1], [1], [0, 0, 0, 1, 1, 1], [0], [0]>} : vector<2x8x8xf32>, vector<2x8x8xf32>, vector<2x8x8xf32> -> vector<2x8x8xf32>
    "tpu.trace_stop"() : () -> ()
    %262 = vector.broadcast %17 : vector<2x1x8xf32> to vector<2x8x8xf32>
    %263 = arith.addf %261, %262 : vector<2x8x8xf32>
    %cst_109 = arith.constant dense<0xFF800000> : vector<2x8xf32>
    %264 = vector.multi_reduction <maximumf>, %263, %cst_109 [2] : vector<2x8x8xf32> to vector<2x8xf32>
    %265 = vector.shape_cast %264 : vector<2x8xf32> to vector<2x8x1xf32>
    %266 = vector.broadcast %265 : vector<2x8x1xf32> to vector<2x8x8xf32>
    %267 = arith.subf %263, %266 : vector<2x8x8xf32>
    %268 = math.exp %267 : vector<2x8x8xf32>
    %cst_110 = arith.constant dense<0.000000e+00> : vector<2x8xf32>
    %269 = vector.multi_reduction <add>, %268, %cst_110 [2] : vector<2x8x8xf32> to vector<2x8xf32>
    %270 = vector.shape_cast %269 : vector<2x8xf32> to vector<2x8x1xf32>
    %271 = tpu.reciprocal %270 {approx = true} : vector<2x8x1xf32> -> vector<2x8x1xf32>
    %272 = vector.broadcast %271 : vector<2x8x1xf32> to vector<2x8x8xf32>
    %273 = arith.mulf %268, %272 : vector<2x8x8xf32>
    "tpu.trace_start"() <{level = 10 : i32, message = "bts,bsd->btd"}> : () -> ()
    %cst_111 = arith.constant dense<0.000000e+00> : vector<2x8x8xf32>
    %274 = tpu.matmul %273, %260, %cst_111 {dimension_numbers = #tpu.dot_dimension_numbers<[2], [1], [1], [2], [0, 0, 0, 1, 1, 2], [0], [0]>} : vector<2x8x8xf32>, vector<2x8x8xf32>, vector<2x8x8xf32> -> vector<2x8x8xf32>
    "tpu.trace_stop"() : () -> ()
    %275 = vector.shape_cast %274 : vector<2x8x8xf32> to vector<16x8xf32>
    %276 = arith.truncf %275 : vector<16x8xf32> to vector<16x8xbf16>
    %c6 = arith.constant 6 : index
    %c0_112 = arith.constant 0 : index
    %c0_113 = arith.constant 0 : index
    %277 = vector.load %arg6[%c6, %c0_112, %c0_113] : memref<8x8x32xbf16, #tpu.memory_space<vmem>>, vector<1x8x32xbf16>
    %278 = vector.shape_cast %277 : vector<1x8x32xbf16> to vector<8x32xbf16>
    %cst_114 = arith.constant dense<0.000000e+00> : vector<16x32xf32>
    %279 = tpu.matmul %276, %278, %cst_114 {dimension_numbers = #tpu.dot_dimension_numbers<[1], [0], [0], [1], [0, 0, 1, 1], [], []>} : vector<16x8xbf16>, vector<8x32xbf16>, vector<16x32xf32> -> vector<16x32xf32>
    %280 = arith.addf %257, %279 : vector<16x32xf32>
    %281 = vector.extract_strided_slice %208 {offsets = [0, 0, 24], sizes = [2, 8, 8], strides = [1, 1, 1]} : vector<2x8x32xf32> to vector<2x8x8xf32>
    %282 = vector.extract_strided_slice %210 {offsets = [0, 0, 24], sizes = [2, 8, 8], strides = [1, 1, 1]} : vector<2x8x32xf32> to vector<2x8x8xf32>
    %283 = vector.extract_strided_slice %212 {offsets = [0, 0, 24], sizes = [2, 8, 8], strides = [1, 1, 1]} : vector<2x8x32xf32> to vector<2x8x8xf32>
    "tpu.trace_start"() <{level = 10 : i32, message = "btd,bsd->bts"}> : () -> ()
    %cst_115 = arith.constant dense<0.000000e+00> : vector<2x8x8xf32>
    %284 = tpu.matmul %281, %282, %cst_115 {dimension_numbers = #tpu.dot_dimension_numbers<[2], [2], [1], [1], [0, 0, 0, 1, 1, 1], [0], [0]>} : vector<2x8x8xf32>, vector<2x8x8xf32>, vector<2x8x8xf32> -> vector<2x8x8xf32>
    "tpu.trace_stop"() : () -> ()
    %285 = vector.broadcast %17 : vector<2x1x8xf32> to vector<2x8x8xf32>
    %286 = arith.addf %284, %285 : vector<2x8x8xf32>
    %cst_116 = arith.constant dense<0xFF800000> : vector<2x8xf32>
    %287 = vector.multi_reduction <maximumf>, %286, %cst_116 [2] : vector<2x8x8xf32> to vector<2x8xf32>
    %288 = vector.shape_cast %287 : vector<2x8xf32> to vector<2x8x1xf32>
    %289 = vector.broadcast %288 : vector<2x8x1xf32> to vector<2x8x8xf32>
    %290 = arith.subf %286, %289 : vector<2x8x8xf32>
    %291 = math.exp %290 : vector<2x8x8xf32>
    %cst_117 = arith.constant dense<0.000000e+00> : vector<2x8xf32>
    %292 = vector.multi_reduction <add>, %291, %cst_117 [2] : vector<2x8x8xf32> to vector<2x8xf32>
    %293 = vector.shape_cast %292 : vector<2x8xf32> to vector<2x8x1xf32>
    %294 = tpu.reciprocal %293 {approx = true} : vector<2x8x1xf32> -> vector<2x8x1xf32>
    %295 = vector.broadcast %294 : vector<2x8x1xf32> to vector<2x8x8xf32>
    %296 = arith.mulf %291, %295 : vector<2x8x8xf32>
    "tpu.trace_start"() <{level = 10 : i32, message = "bts,bsd->btd"}> : () -> ()
    %cst_118 = arith.constant dense<0.000000e+00> : vector<2x8x8xf32>
    %297 = tpu.matmul %296, %283, %cst_118 {dimension_numbers = #tpu.dot_dimension_numbers<[2], [1], [1], [2], [0, 0, 0, 1, 1, 2], [0], [0]>} : vector<2x8x8xf32>, vector<2x8x8xf32>, vector<2x8x8xf32> -> vector<2x8x8xf32>
    "tpu.trace_stop"() : () -> ()
    %298 = vector.shape_cast %297 : vector<2x8x8xf32> to vector<16x8xf32>
    %299 = arith.truncf %298 : vector<16x8xf32> to vector<16x8xbf16>
    %c7 = arith.constant 7 : index
    %c0_119 = arith.constant 0 : index
    %c0_120 = arith.constant 0 : index
    %300 = vector.load %arg6[%c7, %c0_119, %c0_120] : memref<8x8x32xbf16, #tpu.memory_space<vmem>>, vector<1x8x32xbf16>
    %301 = vector.shape_cast %300 : vector<1x8x32xbf16> to vector<8x32xbf16>
    %cst_121 = arith.constant dense<0.000000e+00> : vector<16x32xf32>
    %302 = tpu.matmul %299, %301, %cst_121 {dimension_numbers = #tpu.dot_dimension_numbers<[1], [0], [0], [1], [0, 0, 1, 1], [], []>} : vector<16x8xbf16>, vector<8x32xbf16>, vector<16x32xf32> -> vector<16x32xf32>
    %303 = arith.addf %280, %302 : vector<16x32xf32>
    %c1_122 = arith.constant 1 : index
    %c0_123 = arith.constant 0 : index
    %c0_124 = arith.constant 0 : index
    %304 = vector.load %arg7[%c1_122, %c0_123, %c0_124] : memref<2x1x32xf32, #tpu.memory_space<vmem>>, vector<1x1x32xf32>
    %305 = vector.shape_cast %304 : vector<1x1x32xf32> to vector<1x32xf32>
    %306 = vector.broadcast %305 : vector<1x32xf32> to vector<16x32xf32>
    %307 = arith.addf %303, %306 : vector<16x32xf32>
    %308 = arith.addf %198, %307 : vector<16x32xf32>
    %c1_125 = arith.constant 1 : index
    %c0_126 = arith.constant 0 : index
    %c0_127 = arith.constant 0 : index
    %309 = vector.load %arg8[%c1_125, %c0_126, %c0_127] : memref<2x1x32xf32, #tpu.memory_space<vmem>>, vector<1x1x32xf32>
    %310 = vector.shape_cast %309 : vector<1x1x32xf32> to vector<1x32xf32>
    %c1_128 = arith.constant 1 : index
    %c0_129 = arith.constant 0 : index
    %c0_130 = arith.constant 0 : index
    %311 = vector.load %arg9[%c1_128, %c0_129, %c0_130] : memref<2x1x32xf32, #tpu.memory_space<vmem>>, vector<1x1x32xf32>
    %312 = vector.shape_cast %311 : vector<1x1x32xf32> to vector<1x32xf32>
    %cst_131 = arith.constant dense<0.000000e+00> : vector<16xf32>
    %313 = vector.multi_reduction <add>, %308, %cst_131 [1] : vector<16x32xf32> to vector<16xf32>
    %314 = vector.shape_cast %313 : vector<16xf32> to vector<16x1xf32>
    %cst_132 = arith.constant 3.200000e+01 : f32
    %315 = vector.broadcast %cst_132 : f32 to vector<16x1xf32>
    %316 = arith.divf %314, %315 : vector<16x1xf32>
    %317 = vector.broadcast %316 : vector<16x1xf32> to vector<16x32xf32>
    %318 = arith.subf %308, %317 : vector<16x32xf32>
    %319 = arith.mulf %318, %318 : vector<16x32xf32>
    %cst_133 = arith.constant dense<0.000000e+00> : vector<16xf32>
    %320 = vector.multi_reduction <add>, %319, %cst_133 [1] : vector<16x32xf32> to vector<16xf32>
    %321 = vector.shape_cast %320 : vector<16xf32> to vector<16x1xf32>
    %cst_134 = arith.constant 3.200000e+01 : f32
    %322 = vector.broadcast %cst_134 : f32 to vector<16x1xf32>
    %323 = arith.divf %321, %322 : vector<16x1xf32>
    %324 = vector.broadcast %316 : vector<16x1xf32> to vector<16x32xf32>
    %325 = arith.subf %308, %324 : vector<16x32xf32>
    %cst_135 = arith.constant 9.99999974E-6 : f32
    %326 = vector.broadcast %cst_135 : f32 to vector<16x1xf32>
    %327 = arith.addf %323, %326 : vector<16x1xf32>
    %328 = math.rsqrt %327 : vector<16x1xf32>
    %329 = vector.broadcast %328 : vector<16x1xf32> to vector<16x32xf32>
    %330 = arith.mulf %325, %329 : vector<16x32xf32>
    %331 = vector.broadcast %310 : vector<1x32xf32> to vector<16x32xf32>
    %332 = arith.mulf %330, %331 : vector<16x32xf32>
    %333 = vector.broadcast %312 : vector<1x32xf32> to vector<16x32xf32>
    %334 = arith.addf %332, %333 : vector<16x32xf32>
    %335 = arith.truncf %334 : vector<16x32xf32> to vector<16x32xbf16>
    %c1_136 = arith.constant 1 : index
    %c0_137 = arith.constant 0 : index
    %c0_138 = arith.constant 0 : index
    %336 = vector.load %arg10[%c1_136, %c0_137, %c0_138] : memref<2x32x64xbf16, #tpu.memory_space<vmem>>, vector<1x32x64xbf16>
    %337 = vector.shape_cast %336 : vector<1x32x64xbf16> to vector<32x64xbf16>
    %cst_139 = arith.constant dense<0.000000e+00> : vector<16x64xf32>
    %338 = tpu.matmul %335, %337, %cst_139 {dimension_numbers = #tpu.dot_dimension_numbers<[1], [0], [0], [1], [0, 0, 1, 1], [], []>} : vector<16x32xbf16>, vector<32x64xbf16>, vector<16x64xf32> -> vector<16x64xf32>
    %c1_140 = arith.constant 1 : index
    %c0_141 = arith.constant 0 : index
    %c0_142 = arith.constant 0 : index
    %339 = vector.load %arg11[%c1_140, %c0_141, %c0_142] : memref<2x1x64xf32, #tpu.memory_space<vmem>>, vector<1x1x64xf32>
    %340 = vector.shape_cast %339 : vector<1x1x64xf32> to vector<1x64xf32>
    %341 = vector.broadcast %340 : vector<1x64xf32> to vector<16x64xf32>
    %342 = arith.addf %338, %341 : vector<16x64xf32>
    %cst_143 = arith.constant 0.000000e+00 : f32
    %343 = vector.broadcast %cst_143 : f32 to vector<16x64xf32>
    %344 = arith.maximumf %342, %343 : vector<16x64xf32>
    %345 = arith.truncf %344 : vector<16x64xf32> to vector<16x64xbf16>
    %c1_144 = arith.constant 1 : index
    %c0_145 = arith.constant 0 : index
    %c0_146 = arith.constant 0 : index
    %346 = vector.load %arg12[%c1_144, %c0_145, %c0_146] : memref<2x64x32xbf16, #tpu.memory_space<vmem>>, vector<1x64x32xbf16>
    %347 = vector.shape_cast %346 : vector<1x64x32xbf16> to vector<64x32xbf16>
    %cst_147 = arith.constant dense<0.000000e+00> : vector<16x32xf32>
    %348 = tpu.matmul %345, %347, %cst_147 {dimension_numbers = #tpu.dot_dimension_numbers<[1], [0], [0], [1], [0, 0, 1, 1], [], []>} : vector<16x64xbf16>, vector<64x32xbf16>, vector<16x32xf32> -> vector<16x32xf32>
    %c1_148 = arith.constant 1 : index
    %c0_149 = arith.constant 0 : index
    %c0_150 = arith.constant 0 : index
    %349 = vector.load %arg13[%c1_148, %c0_149, %c0_150] : memref<2x1x32xf32, #tpu.memory_space<vmem>>, vector<1x1x32xf32>
    %350 = vector.shape_cast %349 : vector<1x1x32xf32> to vector<1x32xf32>
    %351 = vector.broadcast %350 : vector<1x32xf32> to vector<16x32xf32>
    %352 = arith.addf %348, %351 : vector<16x32xf32>
    %353 = arith.addf %334, %352 : vector<16x32xf32>
    %c1_151 = arith.constant 1 : index
    %c0_152 = arith.constant 0 : index
    %c0_153 = arith.constant 0 : index
    %354 = vector.load %arg14[%c1_151, %c0_152, %c0_153] : memref<2x1x32xf32, #tpu.memory_space<vmem>>, vector<1x1x32xf32>
    %355 = vector.shape_cast %354 : vector<1x1x32xf32> to vector<1x32xf32>
    %c1_154 = arith.constant 1 : index
    %c0_155 = arith.constant 0 : index
    %c0_156 = arith.constant 0 : index
    %356 = vector.load %arg15[%c1_154, %c0_155, %c0_156] : memref<2x1x32xf32, #tpu.memory_space<vmem>>, vector<1x1x32xf32>
    %357 = vector.shape_cast %356 : vector<1x1x32xf32> to vector<1x32xf32>
    %cst_157 = arith.constant dense<0.000000e+00> : vector<16xf32>
    %358 = vector.multi_reduction <add>, %353, %cst_157 [1] : vector<16x32xf32> to vector<16xf32>
    %359 = vector.shape_cast %358 : vector<16xf32> to vector<16x1xf32>
    %cst_158 = arith.constant 3.200000e+01 : f32
    %360 = vector.broadcast %cst_158 : f32 to vector<16x1xf32>
    %361 = arith.divf %359, %360 : vector<16x1xf32>
    %362 = vector.broadcast %361 : vector<16x1xf32> to vector<16x32xf32>
    %363 = arith.subf %353, %362 : vector<16x32xf32>
    %364 = arith.mulf %363, %363 : vector<16x32xf32>
    %cst_159 = arith.constant dense<0.000000e+00> : vector<16xf32>
    %365 = vector.multi_reduction <add>, %364, %cst_159 [1] : vector<16x32xf32> to vector<16xf32>
    %366 = vector.shape_cast %365 : vector<16xf32> to vector<16x1xf32>
    %cst_160 = arith.constant 3.200000e+01 : f32
    %367 = vector.broadcast %cst_160 : f32 to vector<16x1xf32>
    %368 = arith.divf %366, %367 : vector<16x1xf32>
    %369 = vector.broadcast %361 : vector<16x1xf32> to vector<16x32xf32>
    %370 = arith.subf %353, %369 : vector<16x32xf32>
    %cst_161 = arith.constant 9.99999974E-6 : f32
    %371 = vector.broadcast %cst_161 : f32 to vector<16x1xf32>
    %372 = arith.addf %368, %371 : vector<16x1xf32>
    %373 = math.rsqrt %372 : vector<16x1xf32>
    %374 = vector.broadcast %373 : vector<16x1xf32> to vector<16x32xf32>
    %375 = arith.mulf %370, %374 : vector<16x32xf32>
    %376 = vector.broadcast %355 : vector<1x32xf32> to vector<16x32xf32>
    %377 = arith.mulf %375, %376 : vector<16x32xf32>
    %378 = vector.broadcast %357 : vector<1x32xf32> to vector<16x32xf32>
    %379 = arith.addf %377, %378 : vector<16x32xf32>
    %380 = arith.truncf %379 : vector<16x32xf32> to vector<16x32xbf16>
    %c0_162 = arith.constant 0 : index
    %c0_163 = arith.constant 0 : index
    %381 = vector.load %arg16[%c0_162, %c0_163] : memref<32x128xbf16, #tpu.memory_space<vmem>>, vector<32x128xbf16>
    %cst_164 = arith.constant dense<0.000000e+00> : vector<16x128xf32>
    %382 = tpu.matmul %380, %381, %cst_164 {dimension_numbers = #tpu.dot_dimension_numbers<[1], [0], [0], [1], [0, 0, 1, 1], [], []>} : vector<16x32xbf16>, vector<32x128xbf16>, vector<16x128xf32> -> vector<16x128xf32>
    %c0_165 = arith.constant 0 : index
    %c0_166 = arith.constant 0 : index
    %383 = vector.load %arg17[%c0_165, %c0_166] : memref<1x128xf32, #tpu.memory_space<vmem>>, vector<1x128xf32>
    %384 = vector.broadcast %383 : vector<1x128xf32> to vector<16x128xf32>
    %385 = arith.addf %382, %384 : vector<16x128xf32>
    %386 = vector.shape_cast %385 : vector<16x128xf32> to vector<2x8x128xf32>
    %c0_167 = arith.constant 0 : index
    %c0_168 = arith.constant 0 : index
    %c0_169 = arith.constant 0 : index
    %387 = vector.load %arg18[%c0_167, %c0_168, %c0_169] : memref<2x8x128xf32, #tpu.memory_space<vmem>>, vector<2x8x128xf32>
    tpu.vector_store %arg18[%c0_167, %c0_168, %c0_169], %386 {strides = array<i32>} : memref<2x8x128xf32, #tpu.memory_space<vmem>>, vector<2x8x128xf32>,
    return
  }
}

</mosaic_0001>

<bundles_post_ra>
// kernel: wrapper_module_forward.1
= control target key start
LH: loop header
LB: loop body
LE: loop exit
PB: predicated region body
PF: predicated region fallthrough
CT: control target
= control target key end

     0   :  { %s5681_s0 = inlined_call_operand.vmem [shape: s32[2,8], index: 0, kind: input, shape index: {}]   ;;  %s5682_s1 = inlined_call_operand.vmem [shape: s32[16,1], index: 1, kind: input, shape index: {}]   ;;  %s5683_s2 = inlined_call_operand.vmem [shape: f32[128,32], index: 2, kind: input, shape index: {}]   ;;  %s5684_s3 = inlined_call_operand.vmem [shape: f32[16,32], index: 3, kind: input, shape index: {}]   ;;  %s5685_s4 = inlined_call_operand.vmem [shape: bf16[2,32,384], index: 4, kind: input, shape index: {}]   ;;  %s5686_s5 = inlined_call_operand.vmem [shape: f32[2,1,384], index: 5, kind: input, shape index: {}]   ;;  %s5687_s6 = inlined_call_operand.vmem [shape: bf16[8,8,32], index: 6, kind: input, shape index: {}]   ;;  %s5688_s7 = inlined_call_operand.vmem [shape: f32[2,1,32], index: 7, kind: input, shape index: {}]   ;;  %s5689_s8 = inlined_call_operand.vmem [shape: f32[2,1,32], index: 8, kind: input, shape index: {}]   ;;  %s5690_s9 = inlined_call_operand.vmem [shape: f32[2,1,32], index: 9, kind: input, shape index: {}]   ;;  %s5691_s10 = inlined_call_operand.vmem [shape: bf16[2,32,64], index: 10, kind: input, shape index: {}]   ;;  %s5692_s11 = inlined_call_operand.vmem [shape: f32[2,1,64], index: 11, kind: input, shape index: {}]   ;;  %s5693_s12 = inlined_call_operand.vmem [shape: bf16[2,64,32], index: 12, kind: input, shape index: {}]   ;;  %s5694_s13 = inlined_call_operand.vmem [shape: f32[2,1,32], index: 13, kind: input, shape index: {}]   ;;  %s5695_s14 = inlined_call_operand.vmem [shape: f32[2,1,32], index: 14, kind: input, shape index: {}]   ;;  %s5696_s15 = inlined_call_operand.vmem [shape: f32[2,1,32], index: 15, kind: input, shape index: {}]   ;;  %s5697_s16 = inlined_call_operand.vmem [shape: bf16[32,128], index: 16, kind: input, shape index: {}]   ;;  %s5698_s17 = inlined_call_operand.vmem [shape: f32[1,128], index: 17, kind: input, shape index: {}]   ;;  %s5699_s18 = inlined_call_operand.hbm [shape: f32[2,8,128], index: 18, kind: output, shape index: {}]  }
   0x1   :  { %5703 = sst [smem:[#allocation5_spill]] %s5681_s0 }
   0x2   :  { %5704 = sst [smem:[#allocation6_spill]] %s5682_s1 }
   0x3   :  { %5705 = sst [smem:[#allocation7_spill]] %s5683_s2 }
   0x4   :  { %5706 = sst [smem:[#allocation8_spill]] %s5694_s13 }
   0x5   :  { %s5707_s29 = sld [smem:[#allocation6_spill]]  ;;  %s5708_s13 = sld [smem:[#allocation7_spill]]  ;;  %v4888_v2 = vmov 0   ;;  %v4754_v14 = vld [vmem:[%s5685_s4 + $0x4] ss:$12 sps:$4 sm:$0xff]  }
   0x6   :  { %4753 = vset.pattern.permute.xlu0 %v4888_v2  ;;  %288 = vmatprep.mubr.bf16.mxu1 %v4888_v2  ;;  %v4756_v15 = vld [vmem:[%s5685_s4] ss:$12 sps:$4 sm:$0xff]  }
   0x7   :  { %256 = vmatprep.subr.bf16.mxu1 %v4754_v14 }
   0x8   :  { %257 = vmatpush1.bf16.msra.mxu1 %v4756_v15 }
   0xb   :  { %v63_v0 = vld [vmem:[%s5707_s29] sm:$0xff]  ;;  %v76_v3 = vld [vmem:[%s5708_s13 + $0x8] sm:$0xff]  ;;  %v77_v4 = vld [vmem:[%s5708_s13 + $0x10] sm:$0xff] }
   0xc   :  { %v75_v1 = vld [vmem:[%s5708_s13] sm:$0xff]  ;;  %v78_v5 = vld [vmem:[%s5708_s13 + $0x18] sm:$0xff]  ;;  %66 = vperm.xlu0 %4753, %v63_v0   ;;  %v64_v8 = vld [vmem:[%s5707_s29 + $0x8] sm:$0xff] }
   0xd   :  { %v4710_v6 = vpack.c.bf16 %v76_v3, %v75_v1  ;;  %v4714_v7 = vpack.c.bf16 %v78_v5, %v77_v4  ;;  %v79_v9 = vld [vmem:[%s5708_s13 + $0x20] sm:$0xff]  ;;  %v80_v10 = vld [vmem:[%s5708_s13 + $0x28] sm:$0xff]  ;;  %v81_v12 = vld [vmem:[%s5708_s13 + $0x30] sm:$0xff] }
   0xe   :  { %v4718_v11 = vpack.c.bf16 %v80_v10, %v79_v9  ;;  %v82_v13 = vld [vmem:[%s5708_s13 + $0x38] sm:$0xff]  ;;  %v83_v16 = vld [vmem:[%s5708_s13 + $0x40] sm:$0xff]  ;;  %v84_v17 = vld [vmem:[%s5708_s13 + $0x48] sm:$0xff] }
   0xf   :  { %4711 = vmatprep.subr.bf16.mxu0 %v4710_v6  ;;  %v4722_v18 = vpack.c.bf16 %v82_v13, %v81_v12  ;;  %v85_v19 = vld [vmem:[%s5708_s13 + $0x50] sm:$0xff]  ;;  %v86_v20 = vld [vmem:[%s5708_s13 + $0x58] sm:$0xff]  ;;  %v4726_v21 = vpack.c.bf16 %v84_v17, %v83_v16  ;;  %v87_v22 = vld [vmem:[%s5708_s13 + $0x60] sm:$0xff] }
  0x10   :  { %4713 = vmatpush3.bf16.msra.mxu0 %v4710_v6  ;;  %69 = vperm.xlu0 %4753, %v64_v8   ;;  %v88_v23 = vld [vmem:[%s5708_s13 + $0x68] sm:$0xff]  ;;  %v4730_v24 = vpack.c.bf16 %v86_v20, %v85_v19 }
  0x11   :  { %4715 = vmatprep.subr.bf16.mxu0 %v4714_v7  ;;  %v4734_v25 = vpack.c.bf16 %v88_v23, %v87_v22 }
  0x14   :  { %4717 = vmatpush3.bf16.msra.mxu0 %v4714_v7 }
  0x15   :  { %4719 = vmatprep.subr.bf16.mxu0 %v4718_v11 }
  0x18   :  { %4721 = vmatpush3.bf16.msra.mxu0 %v4718_v11 }
  0x19   :  { %4723 = vmatprep.subr.bf16.mxu0 %v4722_v18 }
  0x1c   :  { %4725 = vmatpush3.bf16.msra.mxu0 %v4722_v18 }
  0x1d   :  { %4727 = vmatprep.subr.bf16.mxu0 %v4726_v21 }
  0x20   :  { %4729 = vmatpush3.bf16.msra.mxu0 %v4726_v21 }
  0x21   :  { %4731 = vmatprep.subr.bf16.mxu0 %v4730_v24 }
  0x22   :  { %23 = vsyncpa [#allocation3], 0  ;;  %v89_v26 = vld [vmem:[%s5708_s13 + $0x70] sm:$0xff]  ;;  %v90_v27 = vld [vmem:[%s5708_s13 + $0x78] sm:$0xff]  ;;  %v4889_v29 = vmov 0.0   ;;  %v61_v30 = vlaneseq  ;;  %v4890_v33 = vmov 1.0  }
  0x23   :  { %v4738_v28 = vpack.c.bf16 %v90_v27, %v89_v26  ;;  %v4757_v35 = vld [vmem:[%s5685_s4 + $0x1c] ss:$12 sps:$4 sm:$0xff]   ;;  %v4759_v36 = vld [vmem:[%s5685_s4 + $0x18] ss:$12 sps:$4 sm:$0xff]   ;;  %vm4891_vm2 = vmmov 0   ;;  %vm252_vm3 = vcmask 261120  }
  0x24   :  { %4733 = vmatpush3.bf16.msra.mxu0 %v4730_v24  ;;  %v62_v31 = vand.u32 127, %v61_v30  ;;  %258 = vmatprep.subr.bf16.mxu1 %v4757_v35  ;;  %v92_v37 = vld [vmem:[%s5684_s3 + $0x8] sm:$0xff]  ;;  %v91_v38 = vld [vmem:[%s5684_s3] sm:$0xff]  ;;  %v5092_v46 = vshrl.u32 %v61_v30, 7  ;;  %vm350_vm4 = vcmask 64512   ;;  %s5709_s2 = sld [smem:[#allocation5_spill]] }
  0x25   :  { %4735 = vmatprep.subr.bf16.mxu0 %v4734_v25  ;;  %259 = vmatpush1.bf16.msra.mxu1 %v4759_v36  ;;  %v4760_v43 = vld [vmem:[%s5685_s4 + $0x8] ss:$12 sps:$4 sm:$0xff]   ;;  %v4761_v45 = vld [vmem:[%s5685_s4 + $0x20] ss:$12 sps:$4 sm:$0xff]   ;;  %v4892_v5 = vmov 1966171168  }
  0x26   :  { %4438 = vmatprep.subr.bf16.mxu1 %v4889_v29  ;;  %v211_v47 = vsub.s32 1, %v5092_v46  ;;  %v203_v48 = vld [vmem:[%s5686_s5] sm:$0x7]  ;;  %v5099_v49 = vsub.s32 0, %v5092_v46  ;;  %v215_v54 = vsub.s32 2, %v5092_v46  ;;  %v173_v6 = vunpack.c.l.s4 %v4892_v5  ;;  %s4893_s23 = smov 120  }
  0x27   :  { %s4894_s13 = smov 112   ;;  %s4895_s24 = smov 104   ;;  %vm1011_vm6 = vcmask 1043456   ;;  %vm2033_vm7 = vcmask 523264  }
  0x28   :  { %4737 = vmatpush3.bf16.msra.mxu0 %v4734_v25  ;;  %v212_v50 = vrot.slane %v203_v48, %v211_v47  ;;  %v208_v52 = vrot.slane %v203_v48, %v5099_v49  ;;  %v216_v59 = vrot.slane %v203_v48, %v215_v54  ;;  %v174_v8 = vunpack.c.0.s8 %v173_v6  ;;  %s5710_s27 = sld [smem:[#allocation8_spill]]  ;;  %s4896_s25 = smov [#allocation2]  }
  0x29   :  { %4739 = vmatprep.subr.bf16.mxu0 %v4738_v28 }
  0x2a   :  { %v168_v7 = vld [vmem:[%s5709_s2] sm:$0x3]  ;;  %v177_v9 = vsub.s32 %v174_v8, %v5092_v46 }
  0x2b   :  { %vm169_vm5 = vcmp.eq.s32.totalorder %v168_v7, 0 }
  0x2c   :  { %4741 = vmatpush3.bf16.msra.mxu0 %v4738_v28  ;;  %v170_v10 = vsel %vm169_vm5, -1e+09, %v4889_v29 }
  0x2d   :  { %4461 = vmatprep.subr.mxu0 %v4889_v29  ;;  %v178_v11 = vrot.slane %v170_v10, %v177_v9 }
  0x2f   :  { %v179_v12 = vcombine.high %v178_v11, %v178_v11  ;;  %v186_v13 = vrot.slane %v178_v11, %v177_v9 }
  0x31   :  { %v193_v14 = vrot.slane %v179_v12, %v177_v9  ;;  %v5143_v15 = vrot.slane %v186_v13, %v5099_v49 }
  0x33   :  { %v5146_v17 = vrot.slane %v193_v14, %v5099_v49 }
  0x8b   :  { %v67_v32 = vpop.permute.xlu0 %66 }
  0x8c   :  { %vm71_vm0 = vcmp.eq.s32.totalorder %v62_v31, %v67_v32 }
  0x8d   :  { %4435 = vmatprep.mubr.msk.f32.mxu0 %vm71_vm0, %v4890_v33 }
  0x8f   :  { %v70_v34 = vpop.permute.xlu0 %69 }
  0x90   :  { %vm72_vm1 = vcmp.eq.s32.totalorder %v62_v31, %v70_v34 }
  0x91   :  { %4436 = vmatmul.mubr.msk.f32.vlgmr.msra.gmra.mrb[0].mxu0 %vm72_vm1, %v4890_v33 }
  0x92   :  { %4463 = vmatprep.mubr.msk.f32.mxu0 %vm4891_vm2, %v4889_v29 }
 0x164   :  { %v4437_v39 = vpop.f32.mrb[0].mxu0 }
 0x165   :  { %v5072_v40 = vadd.f32 %v4437_v39, %v92_v37  ;;  %v159_v41 = vpop.f32.mrb[1].mxu0 }
 0x166   :  { %v5074_v42 = vadd.f32 %v159_v41, %v91_v38 }
 0x168   :  { %v194_v44 = vpack.c.bf16 %v5072_v40, %v5074_v42 }
 0x16a   :  { %4145 = vmatmul.mubr.msk.bf16.vlgmr.msra.gmra.mrb[0].mxu1 %vm252_vm3, %v194_v44 }
 0x16b   :  { %4439 = vmatpush3.bf16.msra.mxu1 %v4760_v43  ;;  %4442 = vmatprep.mubr.msk.bf16.mxu1 %vm4891_vm2, %v4889_v29 }
 0x16c   :  { %4440 = vmatprep.subr.bf16.mxu1 %v4889_v29 }
 0x16f   :  { %4441 = vmatpush3.bf16.msra.mxu1 %v4761_v45 }
 0x170   :  { %4446 = vmatprep.subr.mxu1 %v4889_v29 }
 0x172   :  { %4443 = vmatmul.mubr.msk.bf16.vlgmr.msra.gmra.mrb[4].mxu1 %vm252_vm3, %v194_v44 }
 0x173   :  { %4448 = vmatprep.mubr.msk.f32.mxu1 %vm4891_vm2, %v4889_v29 }
 0x23d   :  { %v290_v51 = vpop.f32.mrb[0].mxu1 }
 0x23e   :  { %v292_v53 = vpop.f32.mrb[1].mxu1  ;;  %v5109_v58 = vadd.f32 %v290_v51, %v208_v52 }
 0x23f   :  { %v5105_v55 = vadd.f32 %v292_v53, %v212_v50  ;;  %v294_v56 = vpop.f32.mrb[2].mxu1 }
 0x240   :  { %v296_v57 = vpop.f32.mrb[3].mxu1  ;;  %v5122_v62 = vadd.f32 %v294_v56, %v208_v52 }
 0x241   :  { %4447 = vmatpush3.xpose.msk.msra.mxu1 %vm350_vm4, %v5105_v55  ;;  %v5114_v60 = vadd.f32 %v296_v57, %v212_v50 }
 0x242   :  { %4451 = vmatprep.subr.mxu1 %v4889_v29 }
 0x244   :  { %4449 = vmatmul.mubr.msk.f32.vlgmr.msra.gmra.mrb[8].mxu1 %vm350_vm4, %v5109_v58 }
 0x245   :  { %v333_v61 = vpop.f32.mrb[4].mxu1  ;;  %4452 = vmatpush3.xpose.msk.msra.mxu1 %vm350_vm4, %v5114_v60  ;;  %4453 = vmatprep.mubr.msk.f32.mxu1 %vm4891_vm2, %v4889_v29 }
 0x246   :  { %v5124_v63 = vadd.f32 %v333_v61, %v216_v59  ;;  %v4444_v0 = vpop.f32.mrb[5].mxu1  ;;  %4456 = vmatprep.subr.mxu1 %v4889_v29 }
 0x247   :  { %v336_v1 = vpop.f32.mrb[6].mxu1 }
 0x248   :  { %v5127_v3 = vadd.f32 %v336_v1, %v216_v59  ;;  %v4445_v4 = vpop.f32.mrb[7].mxu1  ;;  %4454 = vmatmul.mubr.msk.f32.vlgmr.msra.gmra.mrb[10].mxu1 %vm350_vm4, %v5122_v62 }
 0x249   :  { %4457 = vmatpush3.msra.mxu1 %v5124_v63  ;;  %4458 = vmatprep.mubr.msk.f32.mxu1 %vm4891_vm2, %v4889_v29 }
 0x24a   :  { %4462 = vmatpush3.msra.mxu0 %v5127_v3  ;;  %4466 = vmatprep.subr.mxu1 %v4889_v29 }
 0x24b   :  { %4471 = vmatprep.subr.mxu0 %v4889_v29 }
 0x317   :  { %v423_v16 = vpop.f32.mrb[8].mxu1 }
 0x318   :  { %v424_v18 = vadd.f32 %v423_v16, %v5143_v15  ;;  %v4450_v19 = vpop.f32.mrb[9].mxu1 }
 0x31a   :  { %v503_v20 = vsel %vm350_vm4, %v424_v18, -inf }
 0x31b   :  { %504 = vmax.xlane.f32.xlu1 %v503_v20  ;;  %v499_v21 = vpop.f32.mrb[10].mxu1 }
 0x31c   :  { %v500_v22 = vadd.f32 %v499_v21, %v5146_v17  ;;  %v4455_v23 = vpop.f32.mrb[11].mxu1 }
 0x31e   :  { %v506_v24 = vsel %vm350_vm4, %v500_v22, -inf }
 0x31f   :  { %507 = vmax.xlane.f32.xlu1 %v506_v24  ;;  %v4159_v24 = vld [vmem:[%s5687_s6 + $0x4] sm:$0xf] }
 0x330   :  { %675 = vrot.lane.b32.xlu1 %v5105_v55, %s4893_s23 }
 0x334   :  { %753 = vrot.lane.b32.xlu1 %v5114_v60, %s4893_s23 }
 0x338   :  { %673 = vrot.lane.b32.xlu1 %v5109_v58, %s4893_s23 }
 0x3a8   :  { %v505_v25 = vpop.xlane.xlu1 %504 }
 0x3a9   :  { %v509_v26 = vsub.f32 %v424_v18, %v505_v25 }
 0x3ab   :  { %v511_v27 = vmul.f32 1.442695, %v509_v26 }
 0x3ac   :  { %v508_v28 = vpop.xlane.xlu1 %507 }
 0x3ad   :  { %4784 = vpow2.f32 %v511_v27  ;;  %v510_v30 = vsub.f32 %v500_v22, %v508_v28  ;;  %v672_v27 = vld [vmem:[%s5687_s6] sm:$0xf] }
 0x3af   :  { %v513_v31 = vmul.f32 1.442695, %v510_v30 }
 0x3b0   :  { %v676_v36 = vpop.permute.xlu1 %675 }
 0x3b1   :  { %4786 = vpow2.f32 %v513_v31  ;;  %v1060_v31 = vsel %vm1011_vm6, %v672_v27, 0 }
 0x3b4   :  { %v754_v37 = vpop.permute.xlu1 %753 }
 0x3b7   :  { %v4785_v32 = vpop.eup %4784 }
 0x3b8   :  { %v515_v33 = vsel %vm350_vm4, %v4785_v32, 0.0  ;;  %v674_v38 = vpop.permute.xlu1 %673 }
 0x3b9   :  { %516 = vadd.xlane.f32.xlu0 %v515_v33 }
 0x3bb   :  { %v4787_v34 = vpop.eup %4786 }
 0x3bc   :  { %v518_v35 = vsel %vm350_vm4, %v4787_v34, 0.0 }
 0x3bd   :  { %519 = vadd.xlane.f32.xlu1 %v518_v35 }
 0x3ce   :  { %751 = vrot.lane.b32.xlu1 %v5122_v62, %s4893_s23 }
 0x446   :  { %v517_v39 = vpop.xlane.xlu0 %516 }
 0x447   :  { %4788 = vrcp.f32 %v517_v39 }
 0x44a   :  { %v520_v41 = vpop.xlane.xlu1 %519 }
 0x44b   :  { %4790 = vrcp.f32 %v520_v41 }
 0x44e   :  { %v752_v50 = vpop.permute.xlu1 %751 }
 0x451   :  { %v4789_v43 = vpop.eup %4788 }
 0x452   :  { %v523_v44 = vmul.f32 %v4789_v43, %v4785_v32 }
 0x454   :  { %4459 = vmatmul.mubr.msk.f32.vlgmr.msra.gmra.mrb[12].mxu1 %vm350_vm4, %v523_v44 }
 0x455   :  { %v4791_v45 = vpop.eup %4790  ;;  %4467 = vmatpush3.xpose.msk.msra.mxu1 %vm350_vm4, %v676_v36  ;;  %4468 = vmatprep.mubr.msk.f32.mxu1 %vm4891_vm2, %v4889_v29 }
 0x456   :  { %v524_v48 = vmul.f32 %v4791_v45, %v4787_v34  ;;  %4476 = vmatprep.subr.mxu1 %v4889_v29 }
 0x458   :  { %4464 = vmatmul.mubr.msk.f32.vlgmr.msra.gmra.mrb[2].mxu0 %vm350_vm4, %v524_v48  ;;  %4469 = vmatmul.mubr.msk.f32.vlgmr.msra.gmra.mrb[14].mxu1 %vm350_vm4, %v674_v38 }
 0x459   :  { %4472 = vmatpush3.xpose.msk.msra.mxu0 %vm350_vm4, %v754_v37  ;;  %4473 = vmatprep.mubr.msk.f32.mxu0 %vm4891_vm2, %v4889_v29 }
 0x45a   :  { %4481 = vmatprep.subr.mxu0 %v4889_v29  ;;  %4478 = vmatprep.mubr.msk.f32.mxu1 %vm4891_vm2, %v4889_v29 }
 0x45c   :  { %4474 = vmatmul.mubr.msk.f32.vlgmr.msra.gmra.mrb[4].mxu0 %vm350_vm4, %v752_v50 }
 0x45d   :  { %4483 = vmatprep.mubr.msk.f32.mxu0 %vm4891_vm2, %v4889_v29 }
 0x527   :  { %v5178_v51 = vpop.f32.mrb[12].mxu1 }
 0x528   :  { %v4460_v52 = vpop.f32.mrb[13].mxu1 }
 0x52b   :  { %v5180_v53 = vpop.f32.mrb[2].mxu0  ;;  %v747_v56 = vpop.f32.mrb[14].mxu1 }
 0x52c   :  { %v671_v57 = vpack.c.bf16 %v5180_v53, %v5178_v51  ;;  %v748_v59 = vadd.f32 %v747_v56, %v5143_v15  ;;  %v4465_v61 = vpop.f32.mrb[3].mxu0  ;;  %v4470_v0 = vpop.f32.mrb[15].mxu1 }
 0x52e   :  { %v829_v1 = vsel %vm350_vm4, %v748_v59, -inf }
 0x52f   :  { %v825_v4 = vpop.f32.mrb[4].mxu0  ;;  %830 = vmax.xlane.f32.xlu0 %v829_v1 }
 0x530   :  { %v826_v5 = vadd.f32 %v825_v4, %v5146_v17  ;;  %v4475_v6 = vpop.f32.mrb[5].mxu0 }
 0x532   :  { %v832_v7 = vsel %vm350_vm4, %v826_v5, -inf }
 0x533   :  { %833 = vmax.xlane.f32.xlu1 %v832_v7 }
 0x544   :  { %1181 = vrot.lane.b32.xlu1 %v5122_v62, %s4894_s13 }
 0x545   :  { %852 = vrot.lane.b32.xlu0 %v5124_v63, %s4893_s23 }
 0x548   :  { %1487 = vrot.lane.b32.xlu1 %v5105_v55, %s4895_s24 }
 0x5bc   :  { %v831_v8 = vpop.xlane.xlu0 %830 }
 0x5bd   :  { %v835_v9 = vsub.f32 %v748_v59, %v831_v8 }
 0x5bf   :  { %v837_v10 = vmul.f32 1.442695, %v835_v9 }
 0x5c0   :  { %v834_v11 = vpop.xlane.xlu1 %833  ;;  %v853_v12 = vpop.permute.xlu0 %852 }
 0x5c1   :  { %4792 = vpow2.f32 %v837_v10  ;;  %v836_v13 = vsub.f32 %v826_v5, %v834_v11  ;;  %4477 = vmatpush3.msra.mxu1 %v853_v12 }
 0x5c2   :  { %4486 = vmatprep.subr.bf16.mxu1 %v4889_v29 }
 0x5c3   :  { %v839_v14 = vmul.f32 1.442695, %v836_v13 }
 0x5c4   :  { %v1182_v33 = vpop.permute.xlu1 %1181 }
 0x5c5   :  { %4794 = vpow2.f32 %v839_v14 }
 0x5cb   :  { %v4793_v16 = vpop.eup %4792 }
 0x5cc   :  { %v841_v18 = vsel %vm350_vm4, %v4793_v16, 0.0 }
 0x5cd   :  { %842 = vadd.xlane.f32.xlu0 %v841_v18 }
 0x5cf   :  { %v4795_v19 = vpop.eup %4794 }
 0x5d0   :  { %v844_v20 = vsel %vm350_vm4, %v4795_v19, 0.0 }
 0x5d1   :  { %845 = vadd.xlane.f32.xlu0 %v844_v20 }
 0x5e7   :  { %929 = vrot.lane.b32.xlu0 %v5127_v3, %s4893_s23 }
 0x5eb   :  { %1183 = vrot.lane.b32.xlu0 %v5114_v60, %s4894_s13 }
 0x5ef   :  { %1105 = vrot.lane.b32.xlu0 %v5105_v55, %s4894_s13  ;;  %v1013_v55 = vsel %vm1011_vm6, %v4159_v24, 0 }
 0x5f3   :  { %1103 = vrot.lane.b32.xlu0 %v5109_v58, %s4894_s13 }
 0x65a   :  { %v843_v21 = vpop.xlane.xlu0 %842 }
 0x65b   :  { %4796 = vrcp.f32 %v843_v21 }
 0x65e   :  { %v846_v22 = vpop.xlane.xlu0 %845 }
 0x65f   :  { %4798 = vrcp.f32 %v846_v22 }
 0x662   :  { %v930_v23 = vpop.permute.xlu0 %929 }
 0x663   :  { %4482 = vmatpush3.msra.mxu0 %v930_v23 }
 0x664   :  { %4492 = vmatprep.subr.bf16.mxu0 %v4889_v29 }
 0x665   :  { %v4797_v25 = vpop.eup %4796 }
 0x666   :  { %v849_v26 = vmul.f32 %v4797_v25, %v4793_v16  ;;  %v1184_v32 = vpop.permute.xlu0 %1183 }
 0x668   :  { %4479 = vmatmul.mubr.msk.f32.vlgmr.msra.gmra.mrb[16].mxu1 %vm350_vm4, %v849_v26 }
 0x669   :  { %v4799_v28 = vpop.eup %4798  ;;  %4487 = vmatpush3.bf16.msra.mxu1 %v1013_v55  ;;  %4488 = vmatprep.mubr.msk.bf16.mxu1 %vm4891_vm2, %v4889_v29 }
 0x66a   :  { %v850_v30 = vmul.f32 %v4799_v28, %v4795_v19  ;;  %4498 = vmatprep.subr.mxu1 %v4889_v29  ;;  %v1106_v39 = vpop.permute.xlu0 %1105 }
 0x66c   :  { %4484 = vmatmul.mubr.msk.f32.vlgmr.msra.gmra.mrb[6].mxu0 %vm350_vm4, %v850_v30 }
 0x66d   :  { %4493 = vmatpush3.bf16.msra.mxu0 %v1060_v31  ;;  %4494 = vmatprep.mubr.msk.bf16.mxu0 %vm4891_vm2, %v4889_v29 }
 0x66e   :  { %4503 = vmatprep.subr.mxu0 %v4889_v29  ;;  %v1104_v48 = vpop.permute.xlu0 %1103 }
 0x670   :  { %4495 = vmatmul.mubr.msk.bf16.vlgmr.msra.gmra.mrb[8].mxu0 %vm350_vm4, %v671_v57 }
 0x671   :  { %4505 = vmatprep.mubr.msk.f32.mxu0 %vm4891_vm2, %v4889_v29 }
 0x676   :  { %4504 = vmatpush3.xpose.msk.msra.mxu0 %vm350_vm4, %v1184_v32 }
 0x677   :  { %4513 = vmatprep.subr.mxu0 %v4889_v29 }
 0x679   :  { %4506 = vmatmul.mubr.msk.f32.vlgmr.msra.gmra.mrb[12].mxu0 %vm350_vm4, %v1182_v33 }
 0x67a   :  { %4515 = vmatprep.mubr.msk.f32.mxu0 %vm4891_vm2, %v4889_v29 }
 0x73b   :  { %v924_v34 = vpop.f32.mrb[16].mxu1 }
 0x73c   :  { %v4480_v35 = vpop.f32.mrb[17].mxu1 }
 0x73f   :  { %v1001_v36 = vpop.f32.mrb[6].mxu0 }
 0x740   :  { %v1005_v37 = vpack.c.bf16 %v1001_v36, %v924_v34  ;;  %v4485_v38 = vpop.f32.mrb[7].mxu0 }
 0x741   :  { %v4168_v38 = vld [vmem:[%s5687_s6 + $0x8] sm:$0xf] }
 0x742   :  { %4489 = vmatmul.mubr.msk.bf16.vlgmr.msra.gmra.mrb[20].mxu1 %vm350_vm4, %v1005_v37 }
 0x743   :  { %4499 = vmatpush3.xpose.msk.msra.mxu1 %vm350_vm4, %v1106_v39  ;;  %v1096_v41 = vpop.f32.mrb[8].mxu0  ;;  %4500 = vmatprep.mubr.msk.f32.mxu1 %vm4891_vm2, %v4889_v29  ;;  %v1440_v39 = vsel %vm1011_vm6, %v4168_v38, 0 }
 0x744   :  { %v4496_v43 = vpop.f32.mrb[9].mxu0  ;;  %4508 = vmatprep.subr.mxu1 %v4889_v29 }
 0x745   :  { %v1099_v44 = vpop.f32.mrb[10].mxu0 }
 0x746   :  { %v4497_v45 = vpop.f32.mrb[11].mxu0 }
 0x74a   :  { %4501 = vmatmul.mubr.msk.f32.vlgmr.msra.gmra.mrb[18].mxu1 %vm350_vm4, %v1104_v48 }
 0x74b   :  { %4510 = vmatprep.mubr.msk.f32.mxu1 %vm4891_vm2, %v4889_v29 }
 0x74c   :  { %v1255_v50 = vpop.f32.mrb[12].mxu0 }
 0x74d   :  { %v1256_v51 = vadd.f32 %v1255_v50, %v5146_v17  ;;  %v4507_v52 = vpop.f32.mrb[13].mxu0 }
 0x74f   :  { %v1262_v53 = vsel %vm350_vm4, %v1256_v51, -inf }
 0x750   :  { %1263 = vmax.xlane.f32.xlu0 %v1262_v53 }
 0x766   :  { %1357 = vrot.lane.b32.xlu0 %v5127_v3, %s4894_s13 }
 0x76a   :  { %1485 = vrot.lane.b32.xlu0 %v5109_v58, %s4895_s24 }
 0x76e   :  { %1565 = vrot.lane.b32.xlu0 %v5114_v60, %s4895_s24 }
 0x7dd   :  { %v1264_v56 = vpop.xlane.xlu0 %1263 }
 0x7de   :  { %v1266_v57 = vsub.f32 %v1256_v51, %v1264_v56 }
 0x7e0   :  { %v1269_v59 = vmul.f32 1.442695, %v1266_v57 }
 0x7e1   :  { %v1358_v61 = vpop.permute.xlu0 %1357 }
 0x7e2   :  { %4800 = vpow2.f32 %v1269_v59  ;;  %4514 = vmatpush3.msra.mxu0 %v1358_v61 }
 0x7e3   :  { %4524 = vmatprep.subr.mxu0 %v4889_v29 }
 0x7e5   :  { %v1486_v14 = vpop.permute.xlu0 %1485 }
 0x7e9   :  { %v1566_v18 = vpop.permute.xlu0 %1565 }
 0x7ec   :  { %v4801_v0 = vpop.eup %4800 }
 0x7ed   :  { %v1274_v1 = vsel %vm350_vm4, %v4801_v0, 0.0 }
 0x7ee   :  { %1275 = vadd.xlane.f32.xlu1 %v1274_v1 }
 0x7ff   :  { %1563 = vrot.lane.b32.xlu1 %v5122_v62, %s4895_s24  ;;  %v1488_v62 = vpop.permute.xlu1 %1487 }
 0x815   :  { %v1049_v4 = vpop.f32.mrb[20].mxu1 }
 0x816   :  { %v5250_v58 = vadd.f32 %v1096_v41, %v1049_v4  ;;  %v4490_v5 = vpop.f32.mrb[21].mxu1 }
 0x817   :  { %v1052_v60 = vpop.f32.mrb[22].mxu1 }
 0x818   :  { %v5252_v6 = vadd.f32 %v1099_v44, %v1052_v60  ;;  %v4491_v7 = vpop.f32.mrb[23].mxu1 }
 0x81d   :  { %v1177_v8 = vpop.f32.mrb[18].mxu1 }
 0x81e   :  { %v1178_v9 = vadd.f32 %v1177_v8, %v5143_v15  ;;  %v4502_v10 = vpop.f32.mrb[19].mxu1 }
 0x820   :  { %v1259_v11 = vsel %vm350_vm4, %v1178_v9, -inf }
 0x821   :  { %1260 = vmax.xlane.f32.xlu0 %v1259_v11 }
 0x837   :  { %1281 = vrot.lane.b32.xlu0 %v5124_v63, %s4894_s13 }
 0x83b   :  { %1663 = vrot.lane.b32.xlu0 %v5124_v63, %s4895_s24 }
 0x87b   :  { %v1276_v12 = vpop.xlane.xlu1 %1275 }
 0x87c   :  { %4802 = vrcp.f32 %v1276_v12 }
 0x87f   :  { %v1564_v63 = vpop.permute.xlu1 %1563 }
 0x886   :  { %v4803_v13 = vpop.eup %4802 }
 0x887   :  { %v1280_v16 = vmul.f32 %v4803_v13, %v4801_v0 }
 0x889   :  { %4516 = vmatmul.mubr.msk.f32.vlgmr.msra.gmra.mrb[14].mxu0 %vm350_vm4, %v1280_v16 }
 0x88a   :  { %4525 = vmatpush3.xpose.msk.msra.mxu0 %vm350_vm4, %v1488_v62  ;;  %4526 = vmatprep.mubr.msk.f32.mxu0 %vm4891_vm2, %v4889_v29 }
 0x88b   :  { %4529 = vmatprep.subr.mxu0 %v4889_v29 }
 0x88d   :  { %4527 = vmatmul.mubr.msk.f32.vlgmr.msra.gmra.mrb[16].mxu0 %vm350_vm4, %v1486_v14 }
 0x88e   :  { %4530 = vmatpush3.xpose.msk.msra.mxu0 %vm350_vm4, %v1566_v18  ;;  %4531 = vmatprep.mubr.msk.f32.mxu0 %vm4891_vm2, %v4889_v29 }
 0x88f   :  { %4539 = vmatprep.subr.mxu0 %v4889_v29 }
 0x891   :  { %4532 = vmatmul.mubr.msk.f32.vlgmr.msra.gmra.mrb[18].mxu0 %vm350_vm4, %v1564_v63 }
 0x892   :  { %4541 = vmatprep.mubr.msk.f32.mxu0 %vm4891_vm2, %v4889_v29 }
 0x8ae   :  { %v1261_v19 = vpop.xlane.xlu0 %1260 }
 0x8af   :  { %v1265_v20 = vsub.f32 %v1178_v9, %v1261_v19  ;;  %v4176_v9 = vld [vmem:[%s5687_s6 + $0xc] sm:$0xf] }
 0x8b0   :  { %v1822_v10 = vsel %vm1011_vm6, %v4176_v9, 0 }
 0x8b1   :  { %v1267_v21 = vmul.f32 1.442695, %v1265_v20 }
 0x8b2   :  { %v1282_v22 = vpop.permute.xlu0 %1281 }
 0x8b3   :  { %4804 = vpow2.f32 %v1267_v21  ;;  %4509 = vmatpush3.msra.mxu1 %v1282_v22 }
 0x8b4   :  { %4518 = vmatprep.subr.bf16.mxu1 %v4889_v29 }
 0x8b6   :  { %v1664_v0 = vpop.permute.xlu0 %1663 }
 0x8bd   :  { %v4805_v23 = vpop.eup %4804 }
 0x8be   :  { %v1271_v24 = vsel %vm350_vm4, %v4805_v23, 0.0 }
 0x8bf   :  { %1272 = vadd.xlane.f32.xlu1 %v1271_v24 }
 0x94c   :  { %v1273_v25 = vpop.xlane.xlu1 %1272 }
 0x94d   :  { %4806 = vrcp.f32 %v1273_v25 }
 0x957   :  { %v4807_v26 = vpop.eup %4806 }
 0x958   :  { %v1279_v55 = vmul.f32 %v4807_v26, %v4805_v23 }
 0x95a   :  { %4511 = vmatmul.mubr.msk.f32.vlgmr.msra.gmra.mrb[24].mxu1 %vm350_vm4, %v1279_v55 }
 0x95b   :  { %4520 = vmatprep.mubr.msk.bf16.mxu1 %vm4891_vm2, %v4889_v29  ;;  %4519 = vmatpush3.bf16.msra.mxu1 %v1440_v39 }
 0x95c   :  { %v1429_v27 = vpop.f32.mrb[14].mxu0  ;;  %4534 = vmatprep.subr.mxu1 %v4889_v29 }
 0x95d   :  { %v4517_v28 = vpop.f32.mrb[15].mxu0 }
 0x960   :  { %v1559_v30 = vpop.f32.mrb[16].mxu0 }
 0x961   :  { %v1560_v31 = vadd.f32 %v1559_v30, %v5143_v15  ;;  %v4528_v32 = vpop.f32.mrb[17].mxu0 }
 0x963   :  { %v1641_v33 = vsel %vm350_vm4, %v1560_v31, -inf }
 0x964   :  { %v1637_v34 = vpop.f32.mrb[18].mxu0  ;;  %1642 = vmax.xlane.f32.xlu1 %v1641_v33 }
 0x965   :  { %v1638_v35 = vadd.f32 %v1637_v34, %v5146_v17  ;;  %v4533_v36 = vpop.f32.mrb[19].mxu0 }
 0x967   :  { %v1644_v37 = vsel %vm350_vm4, %v1638_v35, -inf }
 0x968   :  { %1645 = vmax.xlane.f32.xlu1 %v1644_v37 }
 0x9f1   :  { %v1643_v41 = vpop.xlane.xlu1 %1642 }
 0x9f2   :  { %v1647_v43 = vsub.f32 %v1560_v31, %v1643_v41 }
 0x9f4   :  { %v1649_v44 = vmul.f32 1.442695, %v1647_v43 }
 0x9f5   :  { %v1646_v45 = vpop.xlane.xlu1 %1645 }
 0x9f6   :  { %4808 = vpow2.f32 %v1649_v44  ;;  %v1648_v48 = vsub.f32 %v1638_v35, %v1646_v45  ;;  %v4763_v44 = vld [vmem:[%s5691_s10 + $0x8] sm:$0xff]   ;;  %v4764_v45 = vld [vmem:[%s5693_s12] sm:$0xff]  }
 0x9f8   :  { %v1651_v50 = vmul.f32 1.442695, %v1648_v48  ;;  %v4765_v48 = vld [vmem:[%s5693_s12 + $0x8] sm:$0xff]  }
 0x9fa   :  { %4810 = vpow2.f32 %v1651_v50 }
 0xa00   :  { %v4809_v51 = vpop.eup %4808 }
 0xa01   :  { %v1653_v52 = vsel %vm350_vm4, %v4809_v51, 0.0 }
 0xa02   :  { %1654 = vadd.xlane.f32.xlu1 %v1653_v52 }
 0xa04   :  { %v4811_v53 = vpop.eup %4810 }
 0xa05   :  { %v1656_v56 = vsel %vm350_vm4, %v4811_v53, 0.0 }
 0xa06   :  { %1657 = vadd.xlane.f32.xlu1 %v1656_v56 }
 0xa17   :  { %1739 = vrot.lane.b32.xlu1 %v5127_v3, %s4895_s24 }
 0xa2d   :  { %v1353_v57 = vpop.f32.mrb[24].mxu1 }
 0xa2e   :  { %v1433_v59 = vpack.c.bf16 %v1429_v27, %v1353_v57  ;;  %v4512_v61 = vpop.f32.mrb[25].mxu1 }
 0xa30   :  { %4521 = vmatmul.mubr.msk.bf16.vlgmr.msra.gmra.mrb[28].mxu1 %vm350_vm4, %v1433_v59 }
 0xa31   :  { %4535 = vmatpush3.msra.mxu1 %v1664_v0  ;;  %4536 = vmatprep.mubr.msk.f32.mxu1 %vm4891_vm2, %v4889_v29  ;;  %v4179_v0 = vld [vmem:[%s5689_s8] ss:$0 sm:$0xff] }
 0xa32   :  { %4544 = vmatprep.subr.bf16.mxu1 %v4889_v29 }
 0xa8f   :  { %v1655_v1 = vpop.xlane.xlu1 %1654 }
 0xa90   :  { %4812 = vrcp.f32 %v1655_v1 }
 0xa93   :  { %v1658_v4 = vpop.xlane.xlu1 %1657 }
 0xa94   :  { %4814 = vrcp.f32 %v1658_v4 }
 0xa97   :  { %v1740_v5 = vpop.permute.xlu1 %1739 }
 0xa98   :  { %4540 = vmatpush3.msra.mxu0 %v1740_v5 }
 0xa99   :  { %4550 = vmatprep.subr.bf16.mxu0 %v4889_v29 }
 0xa9a   :  { %v4813_v3 = vpop.eup %4812 }
 0xa9b   :  { %v1661_v60 = vmul.f32 %v4813_v3, %v4809_v51  ;;  %v4180_v3 = vld [vmem:[%s5690_s9] ss:$0 sm:$0xff] }
 0xa9d   :  { %4537 = vmatmul.mubr.msk.f32.vlgmr.msra.gmra.mrb[26].mxu1 %vm350_vm4, %v1661_v60 }
 0xa9e   :  { %v4815_v7 = vpop.eup %4814  ;;  %4546 = vmatprep.mubr.msk.bf16.mxu1 %vm4891_vm2, %v4889_v29  ;;  %4545 = vmatpush3.bf16.msra.mxu1 %v1822_v10  ;;  %v4766_v10 = vld [vmem:[%s5693_s12 + $0x10] sm:$0xff]  }
 0xa9f   :  { %v1662_v8 = vmul.f32 %v4815_v7, %v4811_v53  ;;  %4558 = vmatprep.subr.bf16.mxu1 %v4889_v29 }
 0xaa1   :  { %4542 = vmatmul.mubr.msk.f32.vlgmr.msra.gmra.mrb[20].mxu0 %vm350_vm4, %v1662_v8 }
 0xaa2   :  { %4554 = vmatprep.mubr.msk.bf16.mxu0 %vm4891_vm2, %v4889_v29 }
 0xb03   :  { %v1476_v11 = vpop.f32.mrb[28].mxu1 }
 0xb04   :  { %v1483_v62 = vadd.f32 %v1476_v11, %v5250_v58  ;;  %v4522_v12 = vpop.f32.mrb[29].mxu1  ;;  %v4178_v58 = vld [vmem:[%s5688_s7] ss:$0 sm:$0xff]  ;;  %v4767_v11 = vld [vmem:[%s5693_s12 + $0x18] sm:$0xff]  }
 0xb05   :  { %v1479_v13 = vpop.f32.mrb[30].mxu1 }
 0xb06   :  { %v1484_v14 = vadd.f32 %v1479_v13, %v5252_v6  ;;  %v4523_v16 = vpop.f32.mrb[31].mxu1 }
 0xb70   :  { %v1735_v18 = vpop.f32.mrb[26].mxu1 }
 0xb71   :  { %v4538_v63 = vpop.f32.mrb[27].mxu1 }
 0xb74   :  { %v1811_v19 = vpop.f32.mrb[20].mxu0 }
 0xb75   :  { %v1815_v20 = vpack.c.bf16 %v1811_v19, %v1735_v18  ;;  %v4543_v21 = vpop.f32.mrb[21].mxu0 }
 0xb76   :  { %v4185_v21 = vld [vmem:[%s5710_s27] ss:$0 sm:$0xff] }
 0xb77   :  { %4547 = vmatmul.mubr.msk.bf16.vlgmr.msra.gmra.mrb[32].mxu1 %vm350_vm4, %v1815_v20 }
 0xb78   :  { %4566 = vmatprep.mubr.msk.bf16.mxu1 %vm4891_vm2, %v4889_v29  ;;  %4559 = vmatpush3.bf16.msra.mxu1 %v4764_v45 }
 0xb79   :  { %4560 = vmatprep.subr.bf16.mxu1 %v4889_v29 }
 0xb7c   :  { %4561 = vmatpush3.bf16.msra.mxu1 %v4765_v48 }
 0xb7d   :  { %4562 = vmatprep.subr.bf16.mxu1 %v4889_v29 }
 0xb80   :  { %4563 = vmatpush3.bf16.msra.mxu1 %v4766_v10 }
 0xb81   :  { %4564 = vmatprep.subr.bf16.mxu1 %v4889_v29 }
 0xb84   :  { %4565 = vmatpush3.bf16.msra.mxu1 %v4767_v11 }
 0xb85   :  { %4578 = vmatprep.subr.mxu1 %v4889_v29 }
 0xc4a   :  { %v1858_v22 = vpop.f32.mrb[32].mxu1 }
 0xc4b   :  { %v1865_v23 = vadd.f32 %v1858_v22, %v1483_v62  ;;  %v4548_v24 = vpop.f32.mrb[33].mxu1  ;;  %v4181_v62 = vld [vmem:[%s5692_s11] ss:$0 sm:$0xff] }
 0xc4c   :  { %v1861_v25 = vpop.f32.mrb[34].mxu1 }
 0xc4d   :  { %v1874_v6 = vadd.f32 %v4178_v58, %v1865_v23  ;;  %v1866_v26 = vadd.f32 %v1861_v25, %v1484_v14  ;;  %v4549_v55 = vpop.f32.mrb[35].mxu1 }
 0xc4f   :  { %v1875_v27 = vadd.f32 %v4178_v58, %v1866_v26  ;;  %v1876_v28 = vadd.f32 %v1874_v6, %v5074_v42 }
 0xc51   :  { %v1880_v30 = vsel %vm252_vm3, %v1876_v28, 0.0  ;;  %v1877_v31 = vadd.f32 %v1875_v27, %v5072_v40  ;;  %v4762_v40 = vld [vmem:[%s5691_s10] sm:$0xff]  }
 0xc52   :  { %1881 = vadd.xlane.f32.xlu0 %v1880_v30  ;;  %4551 = vmatpush3.bf16.msra.mxu0 %v4762_v40  ;;  %v4773_v40 = vld [vmem:[%s5685_s4 + $0x4c] ss:$12 sps:$4 sm:$0xff]  }
 0xc53   :  { %v1883_v32 = vsel %vm252_vm3, %v1877_v31, 0.0  ;;  %4552 = vmatprep.subr.bf16.mxu0 %v4889_v29 }
 0xc54   :  { %1884 = vadd.xlane.f32.xlu1 %v1883_v32 }
 0xc56   :  { %4553 = vmatpush3.bf16.msra.mxu0 %v4763_v44 }
 0xcdf   :  { %v1882_v33 = vpop.xlane.xlu0 %1881 }
 0xce0   :  { %v1887_v34 = vmul.f32 0.03125, %v1882_v33 }
 0xce1   :  { %v1885_v35 = vpop.xlane.xlu1 %1884 }
 0xce2   :  { %v1889_v36 = vsub.f32 %v1876_v28, %v1887_v34  ;;  %v1888_v37 = vmul.f32 0.03125, %v1885_v35 }
 0xce4   :  { %v1890_v38 = vsub.f32 %v1877_v31, %v1888_v37  ;;  %v1891_v39 = vmul.f32 %v1889_v36, %v1889_v36 }
 0xce6   :  { %v1893_v41 = vsel %vm252_vm3, %v1891_v39, 0.0  ;;  %v1892_v43 = vmul.f32 %v1890_v38, %v1890_v38 }
 0xce7   :  { %1894 = vadd.xlane.f32.xlu0 %v1893_v41  ;;  %v4770_v41 = vld [vmem:[%s5685_s4 + $0x34] ss:$12 sps:$4 sm:$0xff]  }
 0xce8   :  { %v1896_v42 = vsel %vm252_vm3, %v1892_v43, 0.0  ;;  %v4768_v43 = vld [vmem:[%s5685_s4 + $0x30] ss:$12 sps:$4 sm:$0xff]   ;;  %2187 = vmatprep.subr.bf16.mxu0 %v4770_v41 }
 0xceb   :  { %1897 = vadd.xlane.f32.xlu0 %v1896_v42  ;;  %v4771_v42 = vld [vmem:[%s5685_s4 + $0x48] ss:$12 sps:$4 sm:$0xff]  }
 0xd74   :  { %v1895_v50 = vpop.xlane.xlu0 %1894 }
 0xd75   :  { %v1899_v51 = vmul.f32 0.03125, %v1895_v50 }
 0xd77   :  { %v1901_v52 = vadd.f32 1e-05, %v1899_v51 }
 0xd78   :  { %v1898_v53 = vpop.xlane.xlu0 %1897 }
 0xd79   :  { %4816 = vrsqrt.f32 %v1901_v52  ;;  %v1900_v56 = vmul.f32 0.03125, %v1898_v53 }
 0xd7b   :  { %v1902_v57 = vadd.f32 1e-05, %v1900_v56 }
 0xd7d   :  { %4818 = vrsqrt.f32 %v1902_v57  ;;  %v4191_v57 = vld [vmem:[%s5695_s14] ss:$0 sm:$0xff] }
 0xd83   :  { %v4817_v59 = vpop.eup %4816 }
 0xd84   :  { %v1905_v61 = vmul.f32 %v4817_v59, %v1889_v36 }
 0xd86   :  { %v1913_v4 = vmul.f32 %v4179_v0, %v1905_v61 }
 0xd87   :  { %v4819_v1 = vpop.eup %4818 }
 0xd88   :  { %v1906_v5 = vmul.f32 %v4819_v1, %v1890_v38  ;;  %v1921_v7 = vadd.f32 %v4180_v3, %v1913_v4  ;;  %v4192_v1 = vld [vmem:[%s5696_s15] ss:$0 sm:$0xff] }
 0xd8a   :  { %v1914_v60 = vmul.f32 %v4179_v0, %v1906_v5 }
 0xd8c   :  { %v1922_v8 = vadd.f32 %v4180_v3, %v1914_v60  ;;  %v4774_v60 = vld [vmem:[%s5685_s4 + $0x38] ss:$12 sps:$4 sm:$0xff]  }
 0xd8e   :  { %v1923_v9 = vpack.c.bf16 %v1922_v8, %v1921_v7 }
 0xd90   :  { %4555 = vmatmul.mubr.msk.bf16.vlgmr.msra.gmra.mrb[24].mxu0 %vm252_vm3, %v1923_v9  ;;  %v4201_v9 = vld [vmem:[%s5686_s5 + $0x3] sm:$0x7] }
 0xd91   :  { %2219 = vmatprep.mubr.bf16.mxu0 %v4888_v2  ;;  %2188 = vmatpush1.bf16.msra.mxu0 %v4768_v43  ;;  %v2144_v10 = vrot.slane %v4201_v9, %v211_v47 }
 0xd92   :  { %2189 = vmatprep.subr.bf16.mxu0 %v4773_v40 }
 0xd95   :  { %2190 = vmatpush1.bf16.msra.mxu0 %v4771_v42 }
 0xd96   :  { %4570 = vmatprep.subr.bf16.mxu0 %v4889_v29 }
 0xe63   :  { %v1984_v12 = vpop.f32.mrb[24].mxu0 }
 0xe64   :  { %v1985_v2 = vadd.f32 %v4181_v62, %v1984_v12  ;;  %v4556_v13 = vpop.f32.mrb[25].mxu0 }
 0xe65   :  { %v1987_v14 = vpop.f32.mrb[26].mxu0 }
 0xe66   :  { %v1988_v16 = vadd.f32 %v4181_v62, %v1987_v14  ;;  %v4557_v18 = vpop.f32.mrb[27].mxu0  ;;  %v1991_v63 = vmax.f32 %v1985_v2, 0.0  ;;  %v2140_v62 = vrot.slane %v4201_v9, %v5099_v49 }
 0xe67   :  { %v2148_v18 = vrot.slane %v4201_v9, %v215_v54 }
 0xe68   :  { %v1992_v19 = vmax.f32 %v1988_v16, 0.0 }
 0xe6a   :  { %v1993_v20 = vpack.c.bf16 %v1992_v19, %v1991_v63 }
 0xe6c   :  { %4567 = vmatmul.mubr.msk.bf16.vlgmr.msra.gmra.mrb[36].mxu1 %vm2033_vm7, %v1993_v20 }
 0xe6d   :  { %4580 = vmatprep.mubr.msk.f32.mxu1 %vm4891_vm2, %v4889_v29 }
 0xf3f   :  { %v2071_v22 = vpop.f32.mrb[36].mxu1 }
 0xf40   :  { %v2072_v58 = vadd.f32 %v4185_v21, %v2071_v22  ;;  %v4568_v23 = vpop.f32.mrb[37].mxu1 }
 0xf41   :  { %v2074_v24 = vpop.f32.mrb[38].mxu1 }
 0xf42   :  { %v2075_v25 = vadd.f32 %v4185_v21, %v2074_v24  ;;  %v4569_v6 = vpop.f32.mrb[39].mxu1  ;;  %v2078_v26 = vadd.f32 %v2072_v58, %v1921_v7 }
 0xf44   :  { %v2082_v55 = vsel %vm252_vm3, %v2078_v26, 0.0  ;;  %v2079_v27 = vadd.f32 %v2075_v25, %v1922_v8  ;;  %v4775_v8 = vld [vmem:[%s5685_s4 + $0x50] ss:$12 sps:$4 sm:$0xff]  }
 0xf45   :  { %2083 = vadd.xlane.f32.xlu0 %v2082_v55 }
 0xf46   :  { %v2085_v28 = vsel %vm252_vm3, %v2079_v27, 0.0 }
 0xf49   :  { %2086 = vadd.xlane.f32.xlu0 %v2085_v28 }
 0xfd2   :  { %v2084_v30 = vpop.xlane.xlu0 %2083 }
 0xfd3   :  { %v2088_v31 = vmul.f32 0.03125, %v2084_v30 }
 0xfd5   :  { %v2090_v32 = vsub.f32 %v2078_v26, %v2088_v31 }
 0xfd6   :  { %v2087_v33 = vpop.xlane.xlu0 %2086 }
 0xfd7   :  { %v2089_v34 = vmul.f32 0.03125, %v2087_v33  ;;  %v2092_v35 = vmul.f32 %v2090_v32, %v2090_v32 }
 0xfd9   :  { %v2091_v36 = vsub.f32 %v2079_v27, %v2089_v34  ;;  %v2094_v37 = vsel %vm252_vm3, %v2092_v35, 0.0 }
 0xfda   :  { %2095 = vadd.xlane.f32.xlu0 %v2094_v37 }
 0xfdb   :  { %v2093_v38 = vmul.f32 %v2091_v36, %v2091_v36 }
 0xfdd   :  { %v2097_v39 = vsel %vm252_vm3, %v2093_v38, 0.0 }
 0xfde   :  { %2098 = vadd.xlane.f32.xlu1 %v2097_v39 }
0x1067   :  { %v2096_v44 = vpop.xlane.xlu0 %2095 }
0x1068   :  { %v2100_v45 = vmul.f32 0.03125, %v2096_v44 }
0x106a   :  { %v2102_v48 = vadd.f32 1e-05, %v2100_v45 }
0x106b   :  { %v2099_v50 = vpop.xlane.xlu1 %2098 }
0x106c   :  { %4820 = vrsqrt.f32 %v2102_v48  ;;  %v2101_v51 = vmul.f32 0.03125, %v2099_v50 }
0x106e   :  { %v2103_v52 = vadd.f32 1e-05, %v2101_v51 }
0x1070   :  { %4822 = vrsqrt.f32 %v2103_v52 }
0x1076   :  { %v4821_v53 = vpop.eup %4820 }
0x1077   :  { %v2106_v56 = vmul.f32 %v4821_v53, %v2090_v32 }
0x1079   :  { %v2114_v61 = vmul.f32 %v4191_v57, %v2106_v56 }
0x107a   :  { %v4823_v59 = vpop.eup %4822 }
0x107b   :  { %v2107_v0 = vmul.f32 %v4823_v59, %v2091_v36  ;;  %v5384_v5 = vadd.f32 %v4192_v1, %v2114_v61 }
0x107d   :  { %v2115_v4 = vmul.f32 %v4191_v57, %v2107_v0 }
0x107f   :  { %v5386_v3 = vadd.f32 %v4192_v1, %v2115_v4 }
0x1081   :  { %v2124_v7 = vpack.c.bf16 %v5386_v3, %v5384_v5 }
0x1083   :  { %4208 = vmatmul.mubr.msk.bf16.vlgmr.msra.gmra.mrb[28].mxu0 %vm252_vm3, %v2124_v7 }
0x1084   :  { %4571 = vmatpush3.bf16.msra.mxu0 %v4774_v60  ;;  %4574 = vmatprep.mubr.msk.bf16.mxu0 %vm4891_vm2, %v4889_v29 }
0x1085   :  { %4572 = vmatprep.subr.bf16.mxu0 %v4889_v29 }
0x1088   :  { %4573 = vmatpush3.bf16.msra.mxu0 %v4775_v8 }
0x1089   :  { %4588 = vmatprep.subr.mxu0 %v4889_v29 }
0x108b   :  { %4575 = vmatmul.mubr.msk.bf16.vlgmr.msra.gmra.mrb[32].mxu0 %vm252_vm3, %v2124_v7 }
0x108c   :  { %4590 = vmatprep.mubr.msk.f32.mxu0 %vm4891_vm2, %v4889_v29 }
0x1156   :  { %v2221_v11 = vpop.f32.mrb[28].mxu0 }
0x1157   :  { %v2223_v12 = vpop.f32.mrb[29].mxu0  ;;  %v5414_v16 = vadd.f32 %v2221_v11, %v2140_v62 }
0x1158   :  { %v5410_v2 = vadd.f32 %v2223_v12, %v2144_v10  ;;  %v2225_v13 = vpop.f32.mrb[30].mxu0 }
0x1159   :  { %v2227_v14 = vpop.f32.mrb[31].mxu0  ;;  %v5427_v49 = vadd.f32 %v2225_v13, %v2140_v62 }
0x115a   :  { %4579 = vmatpush3.xpose.msk.msra.mxu1 %vm350_vm4, %v5410_v2  ;;  %v5419_v63 = vadd.f32 %v2227_v14, %v2144_v10 }
0x115b   :  { %4583 = vmatprep.subr.mxu1 %v4889_v29 }
0x115d   :  { %4581 = vmatmul.mubr.msk.f32.vlgmr.msra.gmra.mrb[40].mxu1 %vm350_vm4, %v5414_v16 }
0x115e   :  { %v2264_v47 = vpop.f32.mrb[32].mxu0  ;;  %4584 = vmatpush3.xpose.msk.msra.mxu1 %vm350_vm4, %v5419_v63  ;;  %4585 = vmatprep.mubr.msk.f32.mxu1 %vm4891_vm2, %v4889_v29 }
0x115f   :  { %v5429_v19 = vadd.f32 %v2264_v47, %v2148_v18  ;;  %v4576_v20 = vpop.f32.mrb[33].mxu0  ;;  %4593 = vmatprep.subr.mxu1 %v4889_v29 }
0x1160   :  { %v2267_v46 = vpop.f32.mrb[34].mxu0 }
0x1161   :  { %v5432_v54 = vadd.f32 %v2267_v46, %v2148_v18  ;;  %v4577_v21 = vpop.f32.mrb[35].mxu0  ;;  %4586 = vmatmul.mubr.msk.f32.vlgmr.msra.gmra.mrb[42].mxu1 %vm350_vm4, %v5427_v49  ;;  %4589 = vmatpush3.msra.mxu0 %v5429_v19 }
0x1162   :  { %4598 = vmatprep.subr.mxu0 %v4889_v29  ;;  %4595 = vmatprep.mubr.msk.f32.mxu1 %vm4891_vm2, %v4889_v29 }
0x1163   :  { %4594 = vmatpush3.msra.mxu1 %v5432_v54 }
0x1164   :  { %4603 = vmatprep.subr.mxu1 %v4889_v29 }
0x1230   :  { %v2343_v22 = vpop.f32.mrb[40].mxu1 }
0x1231   :  { %v2344_v58 = vadd.f32 %v2343_v22, %v5143_v15  ;;  %v4582_v23 = vpop.f32.mrb[41].mxu1 }
0x1232   :  { %v4223_v23 = vld [vmem:[%s5687_s6 + $0x14] sm:$0xf] }
0x1233   :  { %v2423_v24 = vsel %vm350_vm4, %v2344_v58, -inf }
0x1234   :  { %2424 = vmax.xlane.f32.xlu0 %v2423_v24  ;;  %v2419_v25 = vpop.f32.mrb[42].mxu1 }
0x1235   :  { %v2420_v6 = vadd.f32 %v2419_v25, %v5146_v17  ;;  %v4587_v26 = vpop.f32.mrb[43].mxu1 }
0x1236   :  { %v4216_v26 = vld [vmem:[%s5687_s6 + $0x10] sm:$0xf] }
0x1237   :  { %v2426_v55 = vsel %vm350_vm4, %v2420_v6, -inf }
0x1238   :  { %2427 = vmax.xlane.f32.xlu1 %v2426_v55 }
0x1249   :  { %2674 = vrot.lane.b32.xlu1 %v5419_v63, %s4893_s23 }
0x124a   :  { %2596 = vrot.lane.b32.xlu0 %v5410_v2, %s4893_s23 }
0x12c1   :  { %v2425_v27 = vpop.xlane.xlu0 %2424 }
0x12c2   :  { %v2429_v28 = vsub.f32 %v2344_v58, %v2425_v27 }
0x12c4   :  { %v2431_v30 = vmul.f32 1.442695, %v2429_v28  ;;  %v2980_v28 = vsel %vm1011_vm6, %v4216_v26, 0 }
0x12c5   :  { %v2428_v31 = vpop.xlane.xlu1 %2427  ;;  %v2597_v38 = vpop.permute.xlu0 %2596 }
0x12c6   :  { %4824 = vpow2.f32 %v2431_v30  ;;  %v2430_v32 = vsub.f32 %v2420_v6, %v2428_v31  ;;  %v2933_v6 = vsel %vm1011_vm6, %v4223_v23, 0 }
0x12c8   :  { %v2433_v33 = vmul.f32 1.442695, %v2430_v32 }
0x12c9   :  { %v2675_v39 = vpop.permute.xlu1 %2674 }
0x12ca   :  { %4826 = vpow2.f32 %v2433_v33 }
0x12d0   :  { %v4825_v34 = vpop.eup %4824 }
0x12d1   :  { %v2435_v35 = vsel %vm350_vm4, %v4825_v34, 0.0 }
0x12d2   :  { %2436 = vadd.xlane.f32.xlu0 %v2435_v35 }
0x12d4   :  { %v4827_v36 = vpop.eup %4826 }
0x12d5   :  { %v2438_v37 = vsel %vm350_vm4, %v4827_v36, 0.0 }
0x12d6   :  { %2439 = vadd.xlane.f32.xlu1 %v2438_v37 }
0x12e7   :  { %2594 = vrot.lane.b32.xlu1 %v5414_v16, %s4893_s23 }
0x12e8   :  { %2672 = vrot.lane.b32.xlu0 %v5427_v49, %s4893_s23 }
0x135f   :  { %v2437_v41 = vpop.xlane.xlu0 %2436 }
0x1360   :  { %4828 = vrcp.f32 %v2437_v41 }
0x1363   :  { %v2440_v43 = vpop.xlane.xlu1 %2439  ;;  %v2673_v50 = vpop.permute.xlu0 %2672 }
0x1364   :  { %4830 = vrcp.f32 %v2440_v43 }
0x1367   :  { %v2595_v48 = vpop.permute.xlu1 %2594 }
0x136a   :  { %v4829_v42 = vpop.eup %4828 }
0x136b   :  { %v2443_v40 = vmul.f32 %v4829_v42, %v4825_v34 }
0x136d   :  { %4591 = vmatmul.mubr.msk.f32.vlgmr.msra.gmra.mrb[22].mxu0 %vm350_vm4, %v2443_v40 }
0x136e   :  { %v4831_v44 = vpop.eup %4830  ;;  %4599 = vmatpush3.xpose.msk.msra.mxu0 %vm350_vm4, %v2597_v38  ;;  %4600 = vmatprep.mubr.msk.f32.mxu0 %vm4891_vm2, %v4889_v29 }
0x136f   :  { %v2444_v45 = vmul.f32 %v4831_v44, %v4827_v36  ;;  %4608 = vmatprep.subr.mxu0 %v4889_v29 }
0x1371   :  { %4596 = vmatmul.mubr.msk.f32.vlgmr.msra.gmra.mrb[44].mxu1 %vm350_vm4, %v2444_v45  ;;  %4601 = vmatmul.mubr.msk.f32.vlgmr.msra.gmra.mrb[36].mxu0 %vm350_vm4, %v2595_v48 }
0x1372   :  { %4604 = vmatpush3.xpose.msk.msra.mxu1 %vm350_vm4, %v2675_v39  ;;  %4605 = vmatprep.mubr.msk.f32.mxu1 %vm4891_vm2, %v4889_v29 }
0x1373   :  { %4613 = vmatprep.subr.mxu1 %v4889_v29  ;;  %4610 = vmatprep.mubr.msk.f32.mxu0 %vm4891_vm2, %v4889_v29 }
0x1375   :  { %4606 = vmatmul.mubr.msk.f32.vlgmr.msra.gmra.mrb[46].mxu1 %vm350_vm4, %v2673_v50 }
0x1376   :  { %4615 = vmatprep.mubr.msk.f32.mxu1 %vm4891_vm2, %v4889_v29 }
0x1440   :  { %v2514_v51 = vpop.f32.mrb[22].mxu0 }
0x1441   :  { %v4592_v52 = vpop.f32.mrb[23].mxu0 }
0x1444   :  { %v2587_v53 = vpop.f32.mrb[44].mxu1  ;;  %v2668_v56 = vpop.f32.mrb[36].mxu0 }
0x1445   :  { %v2591_v57 = vpack.c.bf16 %v2587_v53, %v2514_v51  ;;  %v2669_v59 = vadd.f32 %v2668_v56, %v5143_v15  ;;  %v4597_v61 = vpop.f32.mrb[45].mxu1  ;;  %v4602_v0 = vpop.f32.mrb[37].mxu0 }
0x1447   :  { %v2750_v1 = vsel %vm350_vm4, %v2669_v59, -inf }
0x1448   :  { %2751 = vmax.xlane.f32.xlu1 %v2750_v1  ;;  %v2746_v4 = vpop.f32.mrb[46].mxu1 }
0x1449   :  { %v2747_v60 = vadd.f32 %v2746_v4, %v5146_v17  ;;  %v4607_v7 = vpop.f32.mrb[47].mxu1 }
0x144b   :  { %v2753_v8 = vsel %vm350_vm4, %v2747_v60, -inf }
0x144c   :  { %2754 = vmax.xlane.f32.xlu0 %v2753_v8 }
0x14d5   :  { %v2752_v9 = vpop.xlane.xlu1 %2751 }
0x14d6   :  { %v2756_v10 = vsub.f32 %v2669_v59, %v2752_v9 }
0x14d8   :  { %v2758_v11 = vmul.f32 1.442695, %v2756_v10 }
0x14d9   :  { %v2755_v62 = vpop.xlane.xlu0 %2754 }
0x14da   :  { %4832 = vpow2.f32 %v2758_v11  ;;  %v2757_v12 = vsub.f32 %v2747_v60, %v2755_v62 }
0x14dc   :  { %v2760_v13 = vmul.f32 1.442695, %v2757_v12 }
0x14de   :  { %4834 = vpow2.f32 %v2760_v13 }
0x14e4   :  { %v4833_v14 = vpop.eup %4832 }
0x14e5   :  { %v2762_v18 = vsel %vm350_vm4, %v4833_v14, 0.0 }
0x14e6   :  { %2763 = vadd.xlane.f32.xlu0 %v2762_v18 }
0x14e8   :  { %v4835_v47 = vpop.eup %4834 }
0x14e9   :  { %v2765_v20 = vsel %vm350_vm4, %v4835_v47, 0.0 }
0x14ea   :  { %2766 = vadd.xlane.f32.xlu1 %v2765_v20 }
0x14fb   :  { %2850 = vrot.lane.b32.xlu1 %v5432_v54, %s4893_s23 }
0x14fc   :  { %2773 = vrot.lane.b32.xlu0 %v5429_v19, %s4893_s23 }
0x14ff   :  { %3103 = vrot.lane.b32.xlu1 %v5419_v63, %s4894_s13 }
0x1500   :  { %3101 = vrot.lane.b32.xlu0 %v5427_v49, %s4894_s13 }
0x1503   :  { %3025 = vrot.lane.b32.xlu1 %v5410_v2, %s4894_s13 }
0x1504   :  { %3023 = vrot.lane.b32.xlu0 %v5414_v16, %s4894_s13 }
0x1573   :  { %v2764_v46 = vpop.xlane.xlu0 %2763 }
0x1574   :  { %4836 = vrcp.f32 %v2764_v46 }
0x1577   :  { %v2767_v21 = vpop.xlane.xlu1 %2766  ;;  %v2774_v22 = vpop.permute.xlu0 %2773 }
0x1578   :  { %4838 = vrcp.f32 %v2767_v21  ;;  %4609 = vmatpush3.msra.mxu0 %v2774_v22 }
0x1579   :  { %4618 = vmatprep.subr.bf16.mxu0 %v4889_v29 }
0x157b   :  { %v2851_v58 = vpop.permute.xlu1 %2850  ;;  %v3102_v31 = vpop.permute.xlu0 %3101 }
0x157c   :  { %4614 = vmatpush3.msra.mxu1 %v2851_v58 }
0x157d   :  { %4624 = vmatprep.subr.bf16.mxu1 %v4889_v29 }
0x157e   :  { %v4837_v24 = vpop.eup %4836 }
0x157f   :  { %v2770_v25 = vmul.f32 %v4837_v24, %v4833_v14  ;;  %v3104_v30 = vpop.permute.xlu1 %3103  ;;  %v3024_v42 = vpop.permute.xlu0 %3023 }
0x1581   :  { %4611 = vmatmul.mubr.msk.f32.vlgmr.msra.gmra.mrb[38].mxu0 %vm350_vm4, %v2770_v25 }
0x1582   :  { %v4839_v55 = vpop.eup %4838  ;;  %4619 = vmatpush3.bf16.msra.mxu0 %v2933_v6  ;;  %4620 = vmatprep.mubr.msk.bf16.mxu0 %vm4891_vm2, %v4889_v29 }
0x1583   :  { %v2771_v27 = vmul.f32 %v4839_v55, %v4835_v47  ;;  %4630 = vmatprep.subr.mxu0 %v4889_v29  ;;  %v3026_v37 = vpop.permute.xlu1 %3025 }
0x1585   :  { %4616 = vmatmul.mubr.msk.f32.vlgmr.msra.gmra.mrb[48].mxu1 %vm350_vm4, %v2771_v27 }
0x1586   :  { %4625 = vmatpush3.bf16.msra.mxu1 %v2980_v28  ;;  %4626 = vmatprep.mubr.msk.bf16.mxu1 %vm4891_vm2, %v4889_v29 }
0x1587   :  { %4635 = vmatprep.subr.mxu1 %v4889_v29 }
0x1589   :  { %4627 = vmatmul.mubr.msk.bf16.vlgmr.msra.gmra.mrb[52].mxu1 %vm350_vm4, %v2591_v57 }
0x158a   :  { %4637 = vmatprep.mubr.msk.f32.mxu1 %vm4891_vm2, %v4889_v29 }
0x158f   :  { %4636 = vmatpush3.xpose.msk.msra.mxu1 %vm350_vm4, %v3104_v30 }
0x1590   :  { %4645 = vmatprep.subr.mxu1 %v4889_v29 }
0x1592   :  { %4638 = vmatmul.mubr.msk.f32.vlgmr.msra.gmra.mrb[50].mxu1 %vm350_vm4, %v3102_v31  ;;  %v4232_v31 = vld [vmem:[%s5687_s6 + $0x18] sm:$0xf] }
0x1593   :  { %4647 = vmatprep.mubr.msk.f32.mxu1 %vm4891_vm2, %v4889_v29 }
0x1654   :  { %v2845_v32 = vpop.f32.mrb[38].mxu0 }
0x1655   :  { %v4612_v33 = vpop.f32.mrb[39].mxu0 }
0x1658   :  { %v2922_v34 = vpop.f32.mrb[48].mxu1 }
0x1659   :  { %v2926_v35 = vpack.c.bf16 %v2922_v34, %v2845_v32  ;;  %v4617_v36 = vpop.f32.mrb[49].mxu1 }
0x165b   :  { %4621 = vmatmul.mubr.msk.bf16.vlgmr.msra.gmra.mrb[40].mxu0 %vm350_vm4, %v2926_v35 }
0x165c   :  { %4631 = vmatpush3.xpose.msk.msra.mxu0 %vm350_vm4, %v3026_v37  ;;  %v3016_v38 = vpop.f32.mrb[52].mxu1  ;;  %4632 = vmatprep.mubr.msk.f32.mxu0 %vm4891_vm2, %v4889_v29 }
0x165d   :  { %v4628_v39 = vpop.f32.mrb[53].mxu1  ;;  %4640 = vmatprep.subr.mxu0 %v4889_v29 }
0x165e   :  { %v3019_v41 = vpop.f32.mrb[54].mxu1 }
0x165f   :  { %v4629_v43 = vpop.f32.mrb[55].mxu1 }
0x1663   :  { %4633 = vmatmul.mubr.msk.f32.vlgmr.msra.gmra.mrb[44].mxu0 %vm350_vm4, %v3024_v42 }
0x1664   :  { %4642 = vmatprep.mubr.msk.f32.mxu0 %vm4891_vm2, %v4889_v29 }
0x1665   :  { %v3175_v40 = vpop.f32.mrb[50].mxu1 }
0x1666   :  { %v3176_v44 = vadd.f32 %v3175_v40, %v5146_v17  ;;  %v4639_v45 = vpop.f32.mrb[51].mxu1 }
0x1668   :  { %v3182_v48 = vsel %vm350_vm4, %v3176_v44, -inf }
0x1669   :  { %3183 = vmax.xlane.f32.xlu1 %v3182_v48 }
0x167a   :  { %3407 = vrot.lane.b32.xlu1 %v5410_v2, %s4895_s24 }
0x167e   :  { %3405 = vrot.lane.b32.xlu1 %v5414_v16, %s4895_s24 }
0x1682   :  { %3483 = vrot.lane.b32.xlu1 %v5427_v49, %s4895_s24 }
0x16f6   :  { %v3184_v50 = vpop.xlane.xlu1 %3183 }
0x16f7   :  { %v3186_v51 = vsub.f32 %v3176_v44, %v3184_v50 }
0x16f9   :  { %v3189_v52 = vmul.f32 1.442695, %v3186_v51 }
0x16fa   :  { %v3408_v8 = vpop.permute.xlu1 %3407 }
0x16fb   :  { %4840 = vpow2.f32 %v3189_v52 }
0x16fe   :  { %v3406_v11 = vpop.permute.xlu1 %3405 }
0x1702   :  { %v3484_v62 = vpop.permute.xlu1 %3483 }
0x1705   :  { %v4841_v53 = vpop.eup %4840 }
0x1706   :  { %v3194_v56 = vsel %vm350_vm4, %v4841_v53, 0.0 }
0x1707   :  { %3195 = vadd.xlane.f32.xlu0 %v3194_v56  ;;  %v4240_v56 = vld [vmem:[%s5687_s6 + $0x1c] sm:$0xf] }
0x171d   :  { %3277 = vrot.lane.b32.xlu0 %v5432_v54, %s4894_s13 }
0x1721   :  { %3485 = vrot.lane.b32.xlu0 %v5419_v63, %s4895_s24 }
0x172e   :  { %v2969_v2 = vpop.f32.mrb[40].mxu0 }
0x172f   :  { %v5537_v57 = vadd.f32 %v3016_v38, %v2969_v2  ;;  %v4622_v16 = vpop.f32.mrb[41].mxu0  ;;  %v3742_v2 = vsel %vm1011_vm6, %v4240_v56, 0 }
0x1730   :  { %v2972_v59 = vpop.f32.mrb[42].mxu0 }
0x1731   :  { %v5539_v49 = vadd.f32 %v3019_v41, %v2972_v59  ;;  %v4623_v61 = vpop.f32.mrb[43].mxu0 }
0x1736   :  { %v3097_v0 = vpop.f32.mrb[44].mxu0 }
0x1737   :  { %v4634_v1 = vpop.f32.mrb[45].mxu0  ;;  %v3098_v4 = vadd.f32 %v3097_v0, %v5143_v15 }
0x1739   :  { %v3179_v60 = vsel %vm350_vm4, %v3098_v4, -inf }
0x1740   :  { %3180 = vmax.xlane.f32.xlu0 %v3179_v60 }
0x1756   :  { %3201 = vrot.lane.b32.xlu0 %v5429_v19, %s4894_s13 }
0x175a   :  { %3583 = vrot.lane.b32.xlu0 %v5429_v19, %s4895_s24 }
0x1794   :  { %v3196_v63 = vpop.xlane.xlu0 %3195 }
0x1795   :  { %4842 = vrcp.f32 %v3196_v63 }
0x1798   :  { %v3278_v7 = vpop.permute.xlu0 %3277 }
0x1799   :  { %4646 = vmatpush3.msra.mxu1 %v3278_v7 }
0x179a   :  { %4656 = vmatprep.subr.mxu1 %v4889_v29 }
0x179c   :  { %v3486_v19 = vpop.permute.xlu0 %3485 }
0x179f   :  { %v4843_v9 = vpop.eup %4842 }
0x17a0   :  { %v3200_v10 = vmul.f32 %v4843_v9, %v4841_v53 }
0x17a2   :  { %4648 = vmatmul.mubr.msk.f32.vlgmr.msra.gmra.mrb[56].mxu1 %vm350_vm4, %v3200_v10 }
0x17a3   :  { %4657 = vmatpush3.xpose.msk.msra.mxu1 %vm350_vm4, %v3408_v8  ;;  %4658 = vmatprep.mubr.msk.f32.mxu1 %vm4891_vm2, %v4889_v29 }
0x17a4   :  { %4661 = vmatprep.subr.mxu1 %v4889_v29 }
0x17a6   :  { %4659 = vmatmul.mubr.msk.f32.vlgmr.msra.gmra.mrb[58].mxu1 %vm350_vm4, %v3406_v11 }
0x17a7   :  { %4662 = vmatpush3.xpose.msk.msra.mxu1 %vm350_vm4, %v3486_v19  ;;  %4663 = vmatprep.mubr.msk.f32.mxu1 %vm4891_vm2, %v4889_v29 }
0x17a8   :  { %4671 = vmatprep.subr.mxu1 %v4889_v29 }
0x17aa   :  { %4664 = vmatmul.mubr.msk.f32.vlgmr.msra.gmra.mrb[60].mxu1 %vm350_vm4, %v3484_v62 }
0x17ab   :  { %4673 = vmatprep.mubr.msk.f32.mxu1 %vm4891_vm2, %v4889_v29 }
0x17cd   :  { %v3181_v12 = vpop.xlane.xlu0 %3180 }
0x17ce   :  { %v3185_v13 = vsub.f32 %v3098_v4, %v3181_v12 }
0x17d0   :  { %v3187_v14 = vmul.f32 1.442695, %v3185_v13 }
0x17d1   :  { %v3202_v18 = vpop.permute.xlu0 %3201 }
0x17d2   :  { %4844 = vpow2.f32 %v3187_v14  ;;  %4641 = vmatpush3.msra.mxu0 %v3202_v18 }
0x17d3   :  { %4650 = vmatprep.subr.bf16.mxu0 %v4889_v29 }
0x17d5   :  { %v3584_v44 = vpop.permute.xlu0 %3583 }
0x17dc   :  { %v4845_v47 = vpop.eup %4844 }
0x17dd   :  { %v3191_v20 = vsel %vm350_vm4, %v4845_v47, 0.0 }
0x17de   :  { %3192 = vadd.xlane.f32.xlu1 %v3191_v20 }
0x186b   :  { %v3193_v46 = vpop.xlane.xlu1 %3192 }
0x186c   :  { %4846 = vrcp.f32 %v3193_v46 }
0x1875   :  { %v3349_v21 = vpop.f32.mrb[56].mxu1 }
0x1876   :  { %v4847_v22 = vpop.eup %4846  ;;  %v4649_v58 = vpop.f32.mrb[57].mxu1 }
0x1877   :  { %v3199_v23 = vmul.f32 %v4847_v22, %v4845_v47 }
0x1879   :  { %4643 = vmatmul.mubr.msk.f32.vlgmr.msra.gmra.mrb[46].mxu0 %vm350_vm4, %v3199_v23  ;;  %v3479_v24 = vpop.f32.mrb[58].mxu1 }
0x187a   :  { %v3480_v25 = vadd.f32 %v3479_v24, %v5143_v15  ;;  %v4660_v6 = vpop.f32.mrb[59].mxu1  ;;  %4652 = vmatprep.mubr.msk.bf16.mxu0 %vm4891_vm2, %v4889_v29  ;;  %v3360_v15 = vsel %vm1011_vm6, %v4232_v31, 0 }
0x187b   :  { %4651 = vmatpush3.bf16.msra.mxu0 %v3360_v15 }
0x187c   :  { %v3561_v26 = vsel %vm350_vm4, %v3480_v25, -inf  ;;  %4666 = vmatprep.subr.mxu0 %v4889_v29 }
0x187d   :  { %3562 = vmax.xlane.f32.xlu1 %v3561_v26  ;;  %v3557_v55 = vpop.f32.mrb[60].mxu1 }
0x187e   :  { %v3558_v27 = vadd.f32 %v3557_v55, %v5146_v17  ;;  %v4665_v28 = vpop.f32.mrb[61].mxu1 }
0x187f   :  { %v4778_v28 = vld [vmem:[%s5693_s12 + $0x20] sm:$0xff]  }
0x1880   :  { %v3564_v30 = vsel %vm350_vm4, %v3558_v27, -inf }
0x1881   :  { %3565 = vmax.xlane.f32.xlu1 %v3564_v30  ;;  %v4779_v30 = vld [vmem:[%s5693_s12 + $0x28] sm:$0xff]  }
0x190a   :  { %v3563_v32 = vpop.xlane.xlu1 %3562 }
0x190b   :  { %v3567_v33 = vsub.f32 %v3480_v25, %v3563_v32 }
0x190d   :  { %v3569_v34 = vmul.f32 1.442695, %v3567_v33 }
0x190e   :  { %v3566_v35 = vpop.xlane.xlu1 %3565 }
0x190f   :  { %4848 = vpow2.f32 %v3569_v34  ;;  %v3568_v36 = vsub.f32 %v3558_v27, %v3566_v35  ;;  %v4777_v27 = vld [vmem:[%s5691_s10 + $0x18] sm:$0xff]  }
0x1911   :  { %v3571_v17 = vmul.f32 1.442695, %v3568_v36 }
0x1913   :  { %4850 = vpow2.f32 %v3571_v17 }
0x1919   :  { %v4849_v37 = vpop.eup %4848 }
0x191a   :  { %v3573_v38 = vsel %vm350_vm4, %v4849_v37, 0.0 }
0x191b   :  { %3574 = vadd.xlane.f32.xlu1 %v3573_v38 }
0x191d   :  { %v4851_v39 = vpop.eup %4850 }
0x191e   :  { %v3576_v41 = vsel %vm350_vm4, %v4851_v39, 0.0 }
0x191f   :  { %3577 = vadd.xlane.f32.xlu1 %v3576_v41 }
0x1930   :  { %3659 = vrot.lane.b32.xlu1 %v5432_v54, %s4895_s24 }
0x194c   :  { %v3273_v43 = vpop.f32.mrb[46].mxu0 }
0x194d   :  { %v3353_v42 = vpack.c.bf16 %v3349_v21, %v3273_v43  ;;  %v4644_v40 = vpop.f32.mrb[47].mxu0  ;;  %v4247_v43 = vld [vmem:[%s5690_s9 + $0x1] ss:$0 sm:$0xff] }
0x194f   :  { %4653 = vmatmul.mubr.msk.bf16.vlgmr.msra.gmra.mrb[48].mxu0 %vm350_vm4, %v3353_v42 }
0x1950   :  { %4667 = vmatpush3.msra.mxu0 %v3584_v44  ;;  %4668 = vmatprep.mubr.msk.f32.mxu0 %vm4891_vm2, %v4889_v29 }
0x1951   :  { %4676 = vmatprep.subr.bf16.mxu0 %v4889_v29 }
0x19a8   :  { %v3575_v45 = vpop.xlane.xlu1 %3574 }
0x19a9   :  { %4852 = vrcp.f32 %v3575_v45 }
0x19ac   :  { %v3578_v48 = vpop.xlane.xlu1 %3577 }
0x19ad   :  { %4854 = vrcp.f32 %v3578_v48  ;;  %v4780_v48 = vld [vmem:[%s5693_s12 + $0x30] sm:$0xff]  }
0x19b0   :  { %v3660_v50 = vpop.permute.xlu1 %3659 }
0x19b1   :  { %4672 = vmatpush3.msra.mxu1 %v3660_v50  ;;  %v4781_v50 = vld [vmem:[%s5693_s12 + $0x38] sm:$0xff]  }
0x19b2   :  { %4682 = vmatprep.subr.bf16.mxu1 %v4889_v29 }
0x19b3   :  { %v4853_v54 = vpop.eup %4852 }
0x19b4   :  { %v3581_v51 = vmul.f32 %v4853_v54, %v4849_v37  ;;  %v4246_v37 = vld [vmem:[%s5689_s8 + $0x1] ss:$0 sm:$0xff] }
0x19b5   :  { %v4253_v54 = vld [vmem:[%s5692_s11 + $0x1] ss:$0 sm:$0xff] }
0x19b6   :  { %4669 = vmatmul.mubr.msk.f32.vlgmr.msra.gmra.mrb[52].mxu0 %vm350_vm4, %v3581_v51 }
0x19b7   :  { %v4855_v52 = vpop.eup %4854  ;;  %4678 = vmatprep.mubr.msk.bf16.mxu0 %vm4891_vm2, %v4889_v29  ;;  %4677 = vmatpush3.bf16.msra.mxu0 %v3742_v2 }
0x19b8   :  { %v3582_v53 = vmul.f32 %v4855_v52, %v4851_v39  ;;  %4690 = vmatprep.subr.bf16.mxu0 %v4889_v29 }
0x19ba   :  { %4674 = vmatmul.mubr.msk.f32.vlgmr.msra.gmra.mrb[62].mxu1 %vm350_vm4, %v3582_v53 }
0x19bb   :  { %4686 = vmatprep.mubr.msk.bf16.mxu1 %vm4891_vm2, %v4889_v29 }
0x1a22   :  { %v3396_v16 = vpop.f32.mrb[48].mxu0 }
0x1a23   :  { %v3403_v59 = vadd.f32 %v3396_v16, %v5537_v57  ;;  %v4654_v61 = vpop.f32.mrb[49].mxu0  ;;  %v4243_v57 = vld [vmem:[%s5688_s7 + $0x1] ss:$0 sm:$0xff] }
0x1a24   :  { %v3399_v0 = vpop.f32.mrb[50].mxu0 }
0x1a25   :  { %v3404_v1 = vadd.f32 %v3399_v0, %v5539_v49  ;;  %v4655_v4 = vpop.f32.mrb[51].mxu0 }
0x1a89   :  { %v3655_v60 = vpop.f32.mrb[52].mxu0 }
0x1a8a   :  { %v4670_v63 = vpop.f32.mrb[53].mxu0 }
0x1a8d   :  { %v3731_v7 = vpop.f32.mrb[62].mxu1 }
0x1a8e   :  { %v3735_v8 = vpack.c.bf16 %v3731_v7, %v3655_v60  ;;  %v4675_v9 = vpop.f32.mrb[63].mxu1 }
0x1a90   :  { %4679 = vmatmul.mubr.msk.bf16.vlgmr.msra.gmra.mrb[56].mxu0 %vm350_vm4, %v3735_v8 }
0x1a91   :  { %4698 = vmatprep.mubr.msk.bf16.mxu0 %vm4891_vm2, %v4889_v29  ;;  %4691 = vmatpush3.bf16.msra.mxu0 %v4778_v28 }
0x1a92   :  { %4692 = vmatprep.subr.bf16.mxu0 %v4889_v29 }
0x1a95   :  { %4693 = vmatpush3.bf16.msra.mxu0 %v4779_v30 }
0x1a96   :  { %4694 = vmatprep.subr.bf16.mxu0 %v4889_v29 }
0x1a99   :  { %4695 = vmatpush3.bf16.msra.mxu0 %v4780_v48 }
0x1a9a   :  { %4696 = vmatprep.subr.bf16.mxu0 %v4889_v29 }
0x1a9d   :  { %4697 = vmatpush3.bf16.msra.mxu0 %v4781_v50 }
0x1b63   :  { %v3778_v10 = vpop.f32.mrb[56].mxu0 }
0x1b64   :  { %v3785_v11 = vadd.f32 %v3778_v10, %v3403_v59  ;;  %v4680_v19 = vpop.f32.mrb[57].mxu0 }
0x1b65   :  { %v3781_v62 = vpop.f32.mrb[58].mxu0 }
0x1b66   :  { %v3795_v49 = vadd.f32 %v4243_v57, %v3785_v11  ;;  %v3786_v12 = vadd.f32 %v3781_v62, %v3404_v1  ;;  %v4681_v13 = vpop.f32.mrb[59].mxu0  ;;  %v4266_v1 = vld [vmem:[%s5710_s27 + $0x1] ss:$0 sm:$0xff] }
0x1b68   :  { %v3796_v14 = vadd.f32 %v4243_v57, %v3786_v12  ;;  %v3797_v18 = vadd.f32 %v3795_v49, %v5384_v5 }
0x1b6a   :  { %v3803_v47 = vsel %vm252_vm3, %v3797_v18, 0.0  ;;  %v3798_v20 = vadd.f32 %v3796_v14, %v5386_v3  ;;  %v4776_v3 = vld [vmem:[%s5691_s10 + $0x10] sm:$0xff]  }
0x1b6b   :  { %3804 = vadd.xlane.f32.xlu0 %v3803_v47  ;;  %4683 = vmatpush3.bf16.msra.mxu1 %v4776_v3 }
0x1b6c   :  { %v3806_v46 = vsel %vm252_vm3, %v3798_v20, 0.0  ;;  %4684 = vmatprep.subr.bf16.mxu1 %v4889_v29 }
0x1b6d   :  { %3807 = vadd.xlane.f32.xlu1 %v3806_v46 }
0x1b6f   :  { %4685 = vmatpush3.bf16.msra.mxu1 %v4777_v27  ;;  %v4274_v27 = vld [vmem:[%s5695_s14 + $0x1] ss:$0 sm:$0xff]  ;;  %s4126_s14 = sshll.u32 %s4896_s25, 4  ;;  %s4127_s14 = int_to_ptr.vmem [resolvable:$true] %s4126_s14 }
0x1b70   :  { %4702 = vmatprep.subr.bf16.mxu1 %v4889_v29  ;;  %p4869_p1 = scmp.lt.s32.totalorder %s4127_s14, %s4127_s14 }
0x1bf8   :  { %v3805_v21 = vpop.xlane.xlu0 %3804 }
0x1bf9   :  { %v3809_v22 = vmul.f32 0.03125, %v3805_v21 }
0x1bfa   :  { %v3808_v58 = vpop.xlane.xlu1 %3807 }
0x1bfb   :  { %v3811_v23 = vsub.f32 %v3797_v18, %v3809_v22  ;;  %v3810_v24 = vmul.f32 0.03125, %v3808_v58  ;;  %v4782_v22 = vld [vmem:[%s5697_s16] sm:$0xff]   ;;  %v4783_v58 = vld [vmem:[%s5697_s16 + $0x8] sm:$0xff]  }
0x1bfd   :  { %v3812_v25 = vsub.f32 %v3798_v20, %v3810_v24  ;;  %v3813_v6 = vmul.f32 %v3811_v23, %v3811_v23 }
0x1bff   :  { %v3815_v26 = vsel %vm252_vm3, %v3813_v6, 0.0  ;;  %v3814_v55 = vmul.f32 %v3812_v25, %v3812_v25 }
0x1c00   :  { %3816 = vadd.xlane.f32.xlu0 %v3815_v26 }
0x1c01   :  { %v3818_v5 = vsel %vm252_vm3, %v3814_v55, 0.0 }
0x1c04   :  { %3819 = vadd.xlane.f32.xlu0 %v3818_v5 }
0x1c8d   :  { %v3817_v31 = vpop.xlane.xlu0 %3816 }
0x1c8e   :  { %v3821_v15 = vmul.f32 0.03125, %v3817_v31 }
0x1c90   :  { %v3823_v32 = vadd.f32 1e-05, %v3821_v15 }
0x1c91   :  { %v3820_v33 = vpop.xlane.xlu0 %3819 }
0x1c92   :  { %4856 = vrsqrt.f32 %v3823_v32  ;;  %v3822_v34 = vmul.f32 0.03125, %v3820_v33 }
0x1c94   :  { %v3824_v35 = vadd.f32 1e-05, %v3822_v34 }
0x1c96   :  { %4858 = vrsqrt.f32 %v3824_v35  ;;  %v4276_v35 = vld [vmem:[%s5698_s17] ss:$0 sm:$0xff] }
0x1c9c   :  { %v4857_v36 = vpop.eup %4856 }
0x1c9d   :  { %v3827_v17 = vmul.f32 %v4857_v36, %v3811_v23 }
0x1c9f   :  { %v3835_v39 = vmul.f32 %v4246_v37, %v3827_v17 }
0x1ca0   :  { %v4859_v38 = vpop.eup %4858 }
0x1ca1   :  { %v3828_v41 = vmul.f32 %v4859_v38, %v3812_v25  ;;  %v3843_v40 = vadd.f32 %v4247_v43, %v3835_v39 }
0x1ca3   :  { %v3836_v42 = vmul.f32 %v4246_v37, %v3828_v41 }
0x1ca5   :  { %v3844_v44 = vadd.f32 %v4247_v43, %v3836_v42 }
0x1ca7   :  { %v3845_v45 = vpack.c.bf16 %v3844_v44, %v3843_v40 }
0x1ca9   :  { %4687 = vmatmul.mubr.msk.bf16.vlgmr.msra.gmra.mrb[64].mxu1 %vm252_vm3, %v3845_v45 }
0x1caa   :  { %4706 = vmatprep.mubr.msk.bf16.mxu1 %vm4891_vm2, %v4889_v29  ;;  %4703 = vmatpush3.bf16.msra.mxu1 %v4782_v22 }
0x1cab   :  { %4704 = vmatprep.subr.bf16.mxu1 %v4889_v29  ;;  %v4275_v29 = vld [vmem:[%s5696_s15 + $0x1] ss:$0 sm:$0xff]  ;;  %s4864_s15 = scalar_lea.vmem %s4127_s14, 256 }
0x1cac   :  { %p4865_p0 = scmp.ne.s32.totalorder %s4127_s14, %s4864_s15  ;;  %p4870_p2 = scmp.lt.s32.totalorder %s4864_s15, %s4864_s15 }
0x1cae   :  { %4705 = vmatpush3.bf16.msra.mxu1 %v4783_v58  ;;  %p4871_p3 = por %p4870_p2, %p4869_p1 }
0x1cb0   :  { %p4872_p4 = pnand %p4871_p3, %p4865_p0 }
0x1d7c   :  { %v3908_v51 = vpop.f32.mrb[64].mxu1 }
0x1d7d   :  { %v3909_v52 = vadd.f32 %v4253_v54, %v3908_v51  ;;  %v4688_v53 = vpop.f32.mrb[65].mxu1 }
0x1d7e   :  { %v3911_v56 = vpop.f32.mrb[66].mxu1 }
0x1d7f   :  { %v3912_v2 = vadd.f32 %v4253_v54, %v3911_v56  ;;  %v4689_v16 = vpop.f32.mrb[67].mxu1  ;;  %v3915_v59 = vmax.f32 %v3909_v52, 0.0 }
0x1d81   :  { %v3916_v61 = vmax.f32 %v3912_v2, 0.0 }
0x1d83   :  { %v3917_v0 = vpack.c.bf16 %v3916_v61, %v3915_v59 }
0x1d85   :  { %4699 = vmatmul.mubr.msk.bf16.vlgmr.msra.gmra.mrb[60].mxu0 %vm2033_vm7, %v3917_v0 }
0x1e58   :  { %v3996_v4 = vpop.f32.mrb[60].mxu0 }
0x1e59   :  { %v3997_v60 = vadd.f32 %v4266_v1, %v3996_v4  ;;  %v4700_v63 = vpop.f32.mrb[61].mxu0 }
0x1e5a   :  { %v3999_v7 = vpop.f32.mrb[62].mxu0 }
0x1e5b   :  { %v4000_v8 = vadd.f32 %v4266_v1, %v3999_v7  ;;  %v4701_v9 = vpop.f32.mrb[63].mxu0  ;;  %v4003_v10 = vadd.f32 %v3997_v60, %v3843_v40 }
0x1e5d   :  { %v4009_v57 = vsel %vm252_vm3, %v4003_v10, 0.0  ;;  %v4004_v11 = vadd.f32 %v4000_v8, %v3844_v44 }
0x1e5e   :  { %4010 = vadd.xlane.f32.xlu0 %v4009_v57 }
0x1e5f   :  { %v4012_v19 = vsel %vm252_vm3, %v4004_v11, 0.0 }
0x1e62   :  { %4013 = vadd.xlane.f32.xlu0 %v4012_v19 }
0x1eeb   :  { %v4011_v62 = vpop.xlane.xlu0 %4010 }
0x1eec   :  { %v4015_v49 = vmul.f32 0.03125, %v4011_v62 }
0x1eee   :  { %v4017_v12 = vsub.f32 %v4003_v10, %v4015_v49 }
0x1eef   :  { %v4014_v13 = vpop.xlane.xlu0 %4013 }
0x1ef0   :  { %v4016_v14 = vmul.f32 0.03125, %v4014_v13  ;;  %v4019_v18 = vmul.f32 %v4017_v12, %v4017_v12 }
0x1ef2   :  { %v4018_v47 = vsub.f32 %v4004_v11, %v4016_v14  ;;  %v4021_v20 = vsel %vm252_vm3, %v4019_v18, 0.0 }
0x1ef3   :  { %4022 = vadd.xlane.f32.xlu0 %v4021_v20 }
0x1ef4   :  { %v4020_v46 = vmul.f32 %v4018_v47, %v4018_v47 }
0x1ef6   :  { %v4024_v21 = vsel %vm252_vm3, %v4020_v46, 0.0 }
0x1ef7   :  { %4025 = vadd.xlane.f32.xlu1 %v4024_v21 }
0x1f80   :  { %v4023_v23 = vpop.xlane.xlu0 %4022 }
0x1f81   :  { %v4027_v24 = vmul.f32 0.03125, %v4023_v23 }
0x1f83   :  { %v4029_v25 = vadd.f32 1e-05, %v4027_v24 }
0x1f84   :  { %v4026_v6 = vpop.xlane.xlu1 %4025 }
0x1f85   :  { %4860 = vrsqrt.f32 %v4029_v25  ;;  %v4028_v26 = vmul.f32 0.03125, %v4026_v6 }
0x1f87   :  { %v4030_v55 = vadd.f32 1e-05, %v4028_v26 }
0x1f89   :  { %4862 = vrsqrt.f32 %v4030_v55 }
0x1f8f   :  { %v4861_v5 = vpop.eup %4860 }
0x1f90   :  { %v4033_v3 = vmul.f32 %v4861_v5, %v4017_v12 }
0x1f92   :  { %v4041_v30 = vmul.f32 %v4274_v27, %v4033_v3 }
0x1f93   :  { %v4863_v28 = vpop.eup %4862 }
0x1f94   :  { %v4034_v31 = vmul.f32 %v4863_v28, %v4018_v47  ;;  %v4049_v32 = vadd.f32 %v4275_v29, %v4041_v30 }
0x1f96   :  { %v4042_v15 = vmul.f32 %v4274_v27, %v4034_v31 }
0x1f98   :  { %v4050_v33 = vadd.f32 %v4275_v29, %v4042_v15 }
0x1f9a   :  { %v4051_v34 = vpack.c.bf16 %v4050_v33, %v4049_v32 }
0x1f9c   :  { %4707 = vmatmul.mubr.msk.bf16.vlgmr.msra.gmra.mrb[68].mxu1 %vm252_vm3, %v4051_v34 }
0x206f   :  { %v4112_v36 = vpop.f32.mrb[68].mxu1 }
0x2070   :  { %v4113_v17 = vadd.f32 %v4276_v35, %v4112_v36  ;;  %v4708_v37 = vpop.f32.mrb[69].mxu1 }
0x2071   :  { %v4115_v38 = vpop.f32.mrb[70].mxu1 }
0x2072   :  { %4119 = vst [vmem:[#allocation2] sm:$0xff] %v4113_v17  ;;  %v4116_v39 = vadd.f32 %v4276_v35, %v4115_v38  ;;  %v4709_v41 = vpop.f32.mrb[71].mxu1 }
0x2074   :  { %4120 = vst [vmem:[#allocation2 + $0x8] sm:$0xff] %v4116_v39 }
0x2075   :  { %4875 = shalt.err (!%p4872_p4)
}
0x2076   :  { %s4876_s28 = scalar_lea.hbm %s5699_s18, 256 }
0x2077   :  { %p4877_p5 = scmp.ne.s32.totalorder %s5699_s18, %s4876_s28  ;;  %p4880_p6 = scmp.lt.u32.totalorder %s4876_s28, %s5699_s18 }
0x2079   :  { %p4882_p7 = pnand %p4880_p6, %p4877_p5 }
0x207b   :  { %4885 = shalt.err (!%p4882_p7)
}
0x207c   :  { %s4897_s1 = smov 128   ;;  %s4898_s4 = smov 8  }
0x207d   :  { %4132 = dma.vmem_to_hbm [thread:$0]  %s4127_s14, 256, %s5699_s18, [#allocation3], %s4897_s1, %s4897_s1, %s4898_s4  }
0x207e   :  { %4886 = dma.done.wait [#allocation3], 256  }
0x207f   :  { %4887 = vsyncadd [#allocation3], 4294967040 }
0x2080   :  { %4136 = vsyncpa [#allocation3], 1 }

</bundles_post_ra>
